<compile_context>
chip_gen: v7x
topology: tpu7x:2x2x1
jax: 0.10.0
libtpu: 0.0.40
codegen_flags: <defaults>
</compile_context>

<pallas_src>
import functools

import jax
import jax.numpy as jnp
from jax.experimental import pallas as pl
from jax.experimental.pallas import tpu as pltpu

_EPS = 1e-5                      # PyTorch nn.LayerNorm default eps
_TM = 256                        # row tile (multiple of 16)
_TN = 256                        # col tile (multiple of 128), K whole per block
_TSEQ = 256                      # flash-attention q/kv sequence tile
_VMEM_LIMIT = 48 * 1024 * 1024   # safe on v5e/v6e/v7x


def _round_up(v, m):
    return (v + m - 1) // m * m


def _pad2d(a, rows, cols):
    r, c = a.shape
    if r == rows and c == cols:
        return a
    return jnp.pad(a, ((0, rows - r), (0, cols - c)))


# ----------------------------------------------------------------------------
# Pallas kernels
# ----------------------------------------------------------------------------
def _fused_linear_kernel(*refs, pre_ln, post_ln, has_bias, has_res, activation):
    """[LayerNorm] -> matmul(bf16 MXU, f32 acc) [+bias] [GELU] [+res] [LayerNorm]."""
    it = iter(refs)
    x_ref = next(it)
    if pre_ln:
        g_ref, b_ref = next(it), next(it)
    w_ref = next(it)
    if has_bias:
        bias_ref = next(it)
    if has_res:
        res_ref = next(it)
    if post_ln:
        pg_ref, pb_ref = next(it), next(it)
    o_ref = next(it)

    x = x_ref[...]                                   # (tm, K)
    if pre_ln:
        x = x.astype(jnp.float32)
        mu = jnp.mean(x, axis=-1, keepdims=True)
        var = jnp.mean(jnp.square(x - mu), axis=-1, keepdims=True)
        x = (x - mu) * jax.lax.rsqrt(var + _EPS) * g_ref[...] + b_ref[...]
    y = jnp.dot(x.astype(jnp.bfloat16), w_ref[...].astype(jnp.bfloat16),
                preferred_element_type=jnp.float32)  # (tm, tn) f32
    if has_bias:
        y = y + bias_ref[...]
    if activation == "gelu":
        # TODO(synk): nn.GELU default is exact erf-GELU; using the tanh
        # approximation because erf lowering in Mosaic is not guaranteed.
        c = 0.7978845608028654  # sqrt(2/pi)
        y = 0.5 * y * (1.0 + jnp.tanh(c * (y + 0.044715 * y * y * y)))
    if has_res:
        y = y + res_ref[...]
    if post_ln:   # only used when tn == full N (LN over the true feature dim)
        mu = jnp.mean(y, axis=-1, keepdims=True)
        var = jnp.mean(jnp.square(y - mu), axis=-1, keepdims=True)
        y = (y - mu) * jax.lax.rsqrt(var + _EPS) * pg_ref[...] + pb_ref[...]
    o_ref[...] = y.astype(o_ref.dtype)


def _layernorm_kernel(x_ref, g_ref, b_ref, o_ref):
    x = x_ref[...].astype(jnp.float32)
    mu = jnp.mean(x, axis=-1, keepdims=True)
    var = jnp.mean(jnp.square(x - mu), axis=-1, keepdims=True)
    o_ref[...] = ((x - mu) * jax.lax.rsqrt(var + _EPS) * g_ref[...]
                  + b_ref[...]).astype(o_ref.dtype)


def _flash_attn_kernel(q_ref, k_ref, v_ref, o_ref, m_ref, l_ref, acc_ref,
                       *, scale, seq_len, tkv, needs_mask):
    """Online-softmax attention for one (batch*head, q-tile) over kv tiles."""
    kvi = pl.program_id(2)

    @pl.when(kvi == 0)
    def _():
        m_ref[...] = jnp.full_like(m_ref, -1e30)
        l_ref[...] = jnp.zeros_like(l_ref)
        acc_ref[...] = jnp.zeros_like(acc_ref)

    q = q_ref[0]                                     # (tq, dh_pad) bf16
    k = k_ref[0]                                     # (tkv, dh_pad) bf16
    v = v_ref[0]

    # q . k^T without an explicit transpose (contract last dims on the MXU).
    s = jax.lax.dot_general(q, k, (((1,), (1,)), ((), ())),
                            preferred_element_type=jnp.float32) * scale
    if needs_mask:
        col = kvi * tkv + jax.lax.broadcasted_iota(jnp.int32, s.shape, 1)
        s = jnp.where(col < seq_len, s, -1e30)       # mask padded kv columns

    m_prev = m_ref[...]                              # (tq, 1)
    m_new = jnp.maximum(m_prev, jnp.max(s, axis=-1, keepdims=True))
    alpha = jnp.exp(m_prev - m_new)
    p = jnp.exp(s - m_new)                           # (tq, tkv) f32
    l_ref[...] = alpha * l_ref[...] + jnp.sum(p, axis=-1, keepdims=True)
    acc_ref[...] = alpha * acc_ref[...] + jnp.dot(
        p.astype(jnp.bfloat16), v, preferred_element_type=jnp.float32)
    m_ref[...] = m_new

    @pl.when(kvi == pl.num_programs(2) - 1)
    def _():
        o_ref[0] = (acc_ref[...] *
                    pl.reciprocal(l_ref[...], approx=True)).astype(o_ref.dtype)


# ----------------------------------------------------------------------------
# Pallas wrappers
# ----------------------------------------------------------------------------
def linear_op(x, w, bias=None, *, ln_gamma=None, ln_beta=None,
              post_ln_gamma=None, post_ln_beta=None, residual=None,
              activation=None, out_dtype=jnp.float32, tm=_TM, tn=_TN):
    """x: (M, K), w: (K, N) -> (M, N) in `out_dtype`.

    Gridded (M//tm, N//tn) Pallas matmul (K held whole per block), optional
    fused pre-LayerNorm, bias, GELU, residual add and post-LayerNorm.
    """
    m, k = x.shape
    kw, n = w.shape
    assert kw == k
    pre_ln = ln_gamma is not None
    post_ln = post_ln_gamma is not None
    has_bias = bias is not None
    has_res = residual is not None

    tm = min(tm, _round_up(m, 16))        # 16-sublane tiles (bf16-safe)
    m_pad = _round_up(m, tm)
    if post_ln:
        # LayerNorm over the output features needs the full N per block.
        tn_eff, n_pad = n, n
    else:
        tn_eff = min(tn, _round_up(n, 128))
        n_pad = _round_up(n, tn_eff)

    args = [_pad2d(x, m_pad, k)]
    in_specs = [pl.BlockSpec((tm, k), lambda i, j: (i, 0))]
    if pre_ln:
        args += [ln_gamma.reshape(1, k).astype(jnp.float32),
                 ln_beta.reshape(1, k).astype(jnp.float32)]
        in_specs += [pl.BlockSpec((1, k), lambda i, j: (0, 0))] * 2
    args.append(_pad2d(w.astype(jnp.bfloat16), k, n_pad))
    in_specs.append(pl.BlockSpec((k, tn_eff), lambda i, j: (0, j)))
    if has_bias:
        args.append(_pad2d(bias.reshape(1, n).astype(jnp.float32), 1, n_pad))
        in_specs.append(pl.BlockSpec((1, tn_eff), lambda i, j: (0, j)))
    if has_res:
        args.append(_pad2d(residual, m_pad, n_pad))
        in_specs.append(pl.BlockSpec((tm, tn_eff), lambda i, j: (i, j)))
    if post_ln:
        args += [post_ln_gamma.reshape(1, n).astype(jnp.float32),
                 post_ln_beta.reshape(1, n).astype(jnp.float32)]
        in_specs += [pl.BlockSpec((1, n_pad), lambda i, j: (0, 0))] * 2

    kern = functools.partial(_fused_linear_kernel, pre_ln=pre_ln,
                             post_ln=post_ln, has_bias=has_bias,
                             has_res=has_res, activation=activation)
    out = pl.pallas_call(
        kern,
        out_shape=jax.ShapeDtypeStruct((m_pad, n_pad), out_dtype),
        grid=(m_pad // tm, n_pad // tn_eff),
        in_specs=in_specs,
        out_specs=pl.BlockSpec((tm, tn_eff), lambda i, j: (i, j)),
        compiler_params=pltpu.CompilerParams(
            dimension_semantics=("parallel", "parallel"),
            vmem_limit_bytes=_VMEM_LIMIT),
    )(*args)
    return out[:m, :n]


def layernorm_op(x, gamma, beta, tm=_TM):
    m, d = x.shape
    tm = min(tm, _round_up(m, 16))
    m_pad = _round_up(m, tm)
    out = pl.pallas_call(
        _layernorm_kernel,
        out_shape=jax.ShapeDtypeStruct((m_pad, d), jnp.float32),
        grid=(m_pad // tm,),
        in_specs=[pl.BlockSpec((tm, d), lambda i: (i, 0)),
                  pl.BlockSpec((1, d), lambda i: (0, 0)),
                  pl.BlockSpec((1, d), lambda i: (0, 0))],
        out_specs=pl.BlockSpec((tm, d), lambda i: (i, 0)),
        compiler_params=pltpu.CompilerParams(
            dimension_semantics=("parallel",)),
    )(_pad2d(x, m_pad, d),
      gamma.reshape(1, d).astype(jnp.float32),
      beta.reshape(1, d).astype(jnp.float32))
    return out[:m]


def attention_op(q, k, v, scale, tseq=_TSEQ):
    """q,k,v: (B*H, N, Dh) bf16 -> flash attention, KV-tiled, (B*H, N, Dh) bf16."""
    bh, n, dh = q.shape
    tq = min(tseq, _round_up(n, 16))
    tkv = tq
    n_pad = _round_up(n, tq)
    dh_pad = _round_up(dh, 128)      # lane-dense Dh (padded tail is zeros)

    def prep(a):
        return jnp.pad(a, ((0, 0), (0, n_pad - n), (0, dh_pad - dh)))

    q_spec = pl.BlockSpec((1, tq, dh_pad), lambda b, i, j: (b, i, 0))
    kv_spec = pl.BlockSpec((1, tkv, dh_pad), lambda b, i, j: (b, j, 0))

    out = pl.pallas_call(
        functools.partial(_flash_attn_kernel, scale=scale, seq_len=n,
                          tkv=tkv, needs_mask=(n_pad != n)),
        out_shape=jax.ShapeDtypeStruct((bh, n_pad, dh_pad), q.dtype),
        grid=(bh, n_pad // tq, n_pad // tkv),
        in_specs=[q_spec, kv_spec, kv_spec],
        out_specs=q_spec,
        scratch_shapes=[pltpu.VMEM((tq, 1), jnp.float32),
                        pltpu.VMEM((tq, 1), jnp.float32),
                        pltpu.VMEM((tq, dh_pad), jnp.float32)],
        compiler_params=pltpu.CompilerParams(
            dimension_semantics=("parallel", "parallel", "arbitrary")),
    )(prep(q), prep(k), prep(v))
    return out[:, :n, :dh]


# ----------------------------------------------------------------------------
# Parameter init (deterministic, synthetic) & forward
# ----------------------------------------------------------------------------
def init_vit_params(key, *, channels, image_size, patch_size, frames,
                    frame_patch_size, dim, depth, heads, dim_head, mlp_dim,
                    num_classes):
    num_patches = (image_size // patch_size) ** 2 * (frames // frame_patch_size)
    patch_dim = channels * patch_size * patch_size * frame_patch_size
    inner = heads * dim_head
    keys = iter(jax.random.split(key, 8 + depth * 8))

    def nrm(shape, scale=0.02):
        return jax.random.normal(next(keys), shape, jnp.float32) * scale

    def wmat(shape):                       # matmul weights stored MXU-native
        return nrm(shape).astype(jnp.bfloat16)

    params = dict(
        patch_ln_g=jnp.ones((patch_dim,), jnp.float32),
        patch_ln_b=jnp.zeros((patch_dim,), jnp.float32),
        patch_w=wmat((patch_dim, dim)),
        patch_b=jnp.zeros((dim,), jnp.float32),
        patch_ln2_g=jnp.ones((dim,), jnp.float32),
        patch_ln2_b=jnp.zeros((dim,), jnp.float32),
        pos_emb=nrm((1, num_patches + 1, dim), 1.0),
        cls_token=nrm((1, 1, dim), 1.0),
        final_ln_g=jnp.ones((dim,), jnp.float32),
        final_ln_b=jnp.zeros((dim,), jnp.float32),
        head_w=wmat((dim, num_classes)),
        head_b=jnp.zeros((num_classes,), jnp.float32),
        layers=[],
    )
    for _ in range(depth):
        params["layers"].append(dict(
            attn_ln_g=jnp.ones((dim,), jnp.float32),
            attn_ln_b=jnp.zeros((dim,), jnp.float32),
            w_qkv=wmat((dim, 3 * inner)),          # to_qkv has no bias
            w_out=wmat((inner, dim)),
            b_out=jnp.zeros((dim,), jnp.float32),
            ff_ln_g=jnp.ones((dim,), jnp.float32),
            ff_ln_b=jnp.zeros((dim,), jnp.float32),
            w1=wmat((dim, mlp_dim)),
            b1=jnp.zeros((mlp_dim,), jnp.float32),
            w2=wmat((mlp_dim, dim)),
            b2=jnp.zeros((dim,), jnp.float32),
        ))
    return params


def vit_enc_forward(params, x, *, patch_size, frame_patch_size, heads,
                    dim_head, pool="cls"):
    b, c, f, hh, ww = x.shape
    pf, p1, p2 = frame_patch_size, patch_size, patch_size
    fb, hb, wb = f // pf, hh // p1, ww // p2

    # rearrange 'b c (f pf) (h p1) (w p2) -> b (f h w) (p1 p2 pf c)'   (glue)
    xr = x.reshape(b, c, fb, pf, hb, p1, wb, p2)
    xr = jnp.transpose(xr, (0, 2, 4, 6, 5, 7, 3, 1))
    patches = xr.reshape(b, fb * hb * wb, p1 * p2 * pf * c)
    n = patches.shape[1]
    patch_dim = patches.shape[2]
    dim = params["patch_w"].shape[1]
    inner = heads * dim_head

    # to_patch_embedding: LayerNorm -> Linear -> LayerNorm (single fused call)
    emb = linear_op(patches.reshape(b * n, patch_dim),
                    params["patch_w"], params["patch_b"],
                    ln_gamma=params["patch_ln_g"], ln_beta=params["patch_ln_b"],
                    post_ln_gamma=params["patch_ln2_g"],
                    post_ln_beta=params["patch_ln2_b"])
    tokens = emb.reshape(b, n, dim)

    # cls token + positional embedding (emb_dropout=0 -> identity)
    cls = jnp.broadcast_to(params["cls_token"], (b, 1, dim))
    tokens = jnp.concatenate([cls, tokens], axis=1) + params["pos_emb"][:, : n + 1]
    n1 = n + 1
    tok2d = tokens.reshape(b * n1, dim)          # residual stream, f32

    scale = dim_head ** -0.5
    for lp in params["layers"]:
        # --- Attention block: x = to_out(Attn(LN(x))) + x ---
        qkv = linear_op(tok2d, lp["w_qkv"],
                        ln_gamma=lp["attn_ln_g"], ln_beta=lp["attn_ln_b"],
                        out_dtype=jnp.bfloat16)
        # TODO(synk): head split via BlockSpec index maps (instead of this one
        # glue transpose) would need dim_head padded to 128 in w_qkv itself.
        qkv = jnp.transpose(qkv.reshape(b, n1, 3, heads, dim_head),
                            (2, 0, 3, 1, 4))            # (3, b, h, n1, dh) bf16
        q = qkv[0].reshape(b * heads, n1, dim_head)
        k = qkv[1].reshape(b * heads, n1, dim_head)
        v = qkv[2].reshape(b * heads, n1, dim_head)
        attn = attention_op(q, k, v, scale)              # (b*h, n1, dh) bf16
        attn = jnp.transpose(attn.reshape(b, heads, n1, dim_head), (0, 2, 1, 3))
        attn = attn.reshape(b * n1, inner)
        tok2d = linear_op(attn, lp["w_out"], lp["b_out"], residual=tok2d)

        # --- FeedForward block: x = W2(GELU(W1 LN(x))) + x ---
        hid = linear_op(tok2d, lp["w1"], lp["b1"],
                        ln_gamma=lp["ff_ln_g"], ln_beta=lp["ff_ln_b"],
                        activation="gelu", out_dtype=jnp.bfloat16)
        tok2d = linear_op(hid, lp["w2"], lp["b2"], residual=tok2d)

    # final LayerNorm -> pool -> mlp_head Linear.
    # LayerNorm is per-token, so for cls pooling LN commutes with the token
    # select and is fused into the head linear (saves a full-token LN pass).
    if pool == "cls":
        pooled = tok2d.reshape(b, n1, dim)[:, 0]
        return linear_op(pooled, params["head_w"], params["head_b"],
                         ln_gamma=params["final_ln_g"],
                         ln_beta=params["final_ln_b"])
    tok2d = layernorm_op(tok2d, params["final_ln_g"], params["final_ln_b"])
    pooled = jnp.mean(tok2d.reshape(b, n1, dim), axis=1)
    return linear_op(pooled, params["head_w"], params["head_b"])


# ----------------------------------------------------------------------------
if __name__ == "__main__":
    # Small shapes consistent with the 3D-ViT encoder (scaled down from
    # image_size=64, frames=64, dim=512, depth=10, heads=16, mlp_dim=2048).
    B, C = 2, 3
    IMAGE, PATCH = 8, 4
    FRAMES, FPATCH = 8, 4
    DIM, DEPTH, HEADS, DIM_HEAD, MLP_DIM, NUM_CLASSES = 64, 2, 4, 16, 128, 16

    key = jax.random.PRNGKey(0)
    kx, kp = jax.random.split(key)
    x = jax.random.normal(kx, (B, C, FRAMES, IMAGE, IMAGE), jnp.float32)
    params = init_vit_params(
        kp, channels=C, image_size=IMAGE, patch_size=PATCH, frames=FRAMES,
        frame_patch_size=FPATCH, dim=DIM, depth=DEPTH, heads=HEADS,
        dim_head=DIM_HEAD, mlp_dim=MLP_DIM, num_classes=NUM_CLASSES)

    fwd = jax.jit(functools.partial(
        vit_enc_forward, patch_size=PATCH, frame_patch_size=FPATCH,
        heads=HEADS, dim_head=DIM_HEAD, pool="cls"))
    out = fwd(params, x)
    jax.block_until_ready(out)
    assert out.shape == (B, NUM_CLASSES), out.shape
    assert bool(jnp.all(jnp.isfinite(out)))
    print("KERNEL_OK")
</pallas_src>

<mosaic_0001>
module attributes {stable_mosaic.version = 11 : i64} {
  func.func @_fused_linear_kernel(%arg0: i32, %arg1: i32, %arg2: memref<16x192xf32, #tpu.memory_space<vmem>>, %arg3: memref<1x192xf32, #tpu.memory_space<vmem>>, %arg4: memref<1x192xf32, #tpu.memory_space<vmem>>, %arg5: memref<192x64xbf16, #tpu.memory_space<vmem>>, %arg6: memref<1x64xf32, #tpu.memory_space<vmem>>, %arg7: memref<1x64xf32, #tpu.memory_space<vmem>>, %arg8: memref<1x64xf32, #tpu.memory_space<vmem>>, %arg9: memref<16x64xf32, #tpu.memory_space<vmem>>) attributes {dimension_semantics = [#tpu.dimension_semantics<parallel>, #tpu.dimension_semantics<parallel>], iteration_bounds = array<i64: 1, 1>, scalar_prefetch = 0 : i64, scratch_operands = 0 : i64, tpu.core_type = #tpu.core_type<tc>, window_params = [{transform_indices = @transform_0, window_bounds = array<i64: 16, 192>}, {pipeline_mode = #tpu.pipeline_mode<synchronous>, transform_indices = @transform_1, window_bounds = array<i64: 1, 192>}, {pipeline_mode = #tpu.pipeline_mode<synchronous>, transform_indices = @transform_2, window_bounds = array<i64: 1, 192>}, {transform_indices = @transform_3, window_bounds = array<i64: 192, 64>}, {transform_indices = @transform_4, window_bounds = array<i64: 1, 64>}, {pipeline_mode = #tpu.pipeline_mode<synchronous>, transform_indices = @transform_5, window_bounds = array<i64: 1, 64>}, {pipeline_mode = #tpu.pipeline_mode<synchronous>, transform_indices = @transform_6, window_bounds = array<i64: 1, 64>}, {transform_indices = @transform_7, window_bounds = array<i64: 16, 64>}]} {
    %c0 = arith.constant 0 : index
    %c0_0 = arith.constant 0 : index
    %0 = vector.load %arg2[%c0, %c0_0] : memref<16x192xf32, #tpu.memory_space<vmem>>, vector<16x192xf32>
    %cst = arith.constant dense<0.000000e+00> : vector<16xf32>
    %1 = vector.multi_reduction <add>, %0, %cst [1] : vector<16x192xf32> to vector<16xf32>
    %2 = vector.shape_cast %1 : vector<16xf32> to vector<16x1xf32>
    %cst_1 = arith.constant 1.920000e+02 : f32
    %3 = vector.broadcast %cst_1 : f32 to vector<16x1xf32>
    %4 = arith.divf %2, %3 : vector<16x1xf32>
    %5 = vector.broadcast %4 : vector<16x1xf32> to vector<16x192xf32>
    %6 = arith.subf %0, %5 : vector<16x192xf32>
    %7 = arith.mulf %6, %6 : vector<16x192xf32>
    %cst_2 = arith.constant dense<0.000000e+00> : vector<16xf32>
    %8 = vector.multi_reduction <add>, %7, %cst_2 [1] : vector<16x192xf32> to vector<16xf32>
    %9 = vector.shape_cast %8 : vector<16xf32> to vector<16x1xf32>
    %cst_3 = arith.constant 1.920000e+02 : f32
    %10 = vector.broadcast %cst_3 : f32 to vector<16x1xf32>
    %11 = arith.divf %9, %10 : vector<16x1xf32>
    %12 = vector.broadcast %4 : vector<16x1xf32> to vector<16x192xf32>
    %13 = arith.subf %0, %12 : vector<16x192xf32>
    %cst_4 = arith.constant 9.99999974E-6 : f32
    %14 = vector.broadcast %cst_4 : f32 to vector<16x1xf32>
    %15 = arith.addf %11, %14 : vector<16x1xf32>
    %16 = math.rsqrt %15 : vector<16x1xf32>
    %17 = vector.broadcast %16 : vector<16x1xf32> to vector<16x192xf32>
    %18 = arith.mulf %13, %17 : vector<16x192xf32>
    %c0_5 = arith.constant 0 : index
    %c0_6 = arith.constant 0 : index
    %19 = vector.load %arg3[%c0_5, %c0_6] : memref<1x192xf32, #tpu.memory_space<vmem>>, vector<1x192xf32>
    %20 = vector.broadcast %19 : vector<1x192xf32> to vector<16x192xf32>
    %21 = arith.mulf %18, %20 : vector<16x192xf32>
    %c0_7 = arith.constant 0 : index
    %c0_8 = arith.constant 0 : index
    %22 = vector.load %arg4[%c0_7, %c0_8] : memref<1x192xf32, #tpu.memory_space<vmem>>, vector<1x192xf32>
    %23 = vector.broadcast %22 : vector<1x192xf32> to vector<16x192xf32>
    %24 = arith.addf %21, %23 : vector<16x192xf32>
    %25 = arith.truncf %24 : vector<16x192xf32> to vector<16x192xbf16>
    %c0_9 = arith.constant 0 : index
    %c0_10 = arith.constant 0 : index
    %26 = vector.load %arg5[%c0_9, %c0_10] : memref<192x64xbf16, #tpu.memory_space<vmem>>, vector<192x64xbf16>
    %cst_11 = arith.constant dense<0.000000e+00> : vector<16x64xf32>
    %27 = tpu.matmul %25, %26, %cst_11 {dimension_numbers = #tpu.dot_dimension_numbers<[1], [0], [0], [1], [0, 0, 1, 1], [], []>} : vector<16x192xbf16>, vector<192x64xbf16>, vector<16x64xf32> -> vector<16x64xf32>
    %c0_12 = arith.constant 0 : index
    %c0_13 = arith.constant 0 : index
    %28 = vector.load %arg6[%c0_12, %c0_13] : memref<1x64xf32, #tpu.memory_space<vmem>>, vector<1x64xf32>
    %29 = vector.broadcast %28 : vector<1x64xf32> to vector<16x64xf32>
    %30 = arith.addf %27, %29 : vector<16x64xf32>
    %cst_14 = arith.constant dense<0.000000e+00> : vector<16xf32>
    %31 = vector.multi_reduction <add>, %30, %cst_14 [1] : vector<16x64xf32> to vector<16xf32>
    %32 = vector.shape_cast %31 : vector<16xf32> to vector<16x1xf32>
    %cst_15 = arith.constant 6.400000e+01 : f32
    %33 = vector.broadcast %cst_15 : f32 to vector<16x1xf32>
    %34 = arith.divf %32, %33 : vector<16x1xf32>
    %35 = vector.broadcast %34 : vector<16x1xf32> to vector<16x64xf32>
    %36 = arith.subf %30, %35 : vector<16x64xf32>
    %37 = arith.mulf %36, %36 : vector<16x64xf32>
    %cst_16 = arith.constant dense<0.000000e+00> : vector<16xf32>
    %38 = vector.multi_reduction <add>, %37, %cst_16 [1] : vector<16x64xf32> to vector<16xf32>
    %39 = vector.shape_cast %38 : vector<16xf32> to vector<16x1xf32>
    %cst_17 = arith.constant 6.400000e+01 : f32
    %40 = vector.broadcast %cst_17 : f32 to vector<16x1xf32>
    %41 = arith.divf %39, %40 : vector<16x1xf32>
    %42 = vector.broadcast %34 : vector<16x1xf32> to vector<16x64xf32>
    %43 = arith.subf %30, %42 : vector<16x64xf32>
    %cst_18 = arith.constant 9.99999974E-6 : f32
    %44 = vector.broadcast %cst_18 : f32 to vector<16x1xf32>
    %45 = arith.addf %41, %44 : vector<16x1xf32>
    %46 = math.rsqrt %45 : vector<16x1xf32>
    %47 = vector.broadcast %46 : vector<16x1xf32> to vector<16x64xf32>
    %48 = arith.mulf %43, %47 : vector<16x64xf32>
    %c0_19 = arith.constant 0 : index
    %c0_20 = arith.constant 0 : index
    %49 = vector.load %arg7[%c0_19, %c0_20] : memref<1x64xf32, #tpu.memory_space<vmem>>, vector<1x64xf32>
    %50 = vector.broadcast %49 : vector<1x64xf32> to vector<16x64xf32>
    %51 = arith.mulf %48, %50 : vector<16x64xf32>
    %c0_21 = arith.constant 0 : index
    %c0_22 = arith.constant 0 : index
    %52 = vector.load %arg8[%c0_21, %c0_22] : memref<1x64xf32, #tpu.memory_space<vmem>>, vector<1x64xf32>
    %53 = vector.broadcast %52 : vector<1x64xf32> to vector<16x64xf32>
    %54 = arith.addf %51, %53 : vector<16x64xf32>
    %c0_23 = arith.constant 0 : index
    %c0_24 = arith.constant 0 : index
    %55 = vector.load %arg9[%c0_23, %c0_24] : memref<16x64xf32, #tpu.memory_space<vmem>>, vector<16x64xf32>
    tpu.vector_store %arg9[%c0_23, %c0_24], %54 {strides = array<i32>} : memref<16x64xf32, #tpu.memory_space<vmem>>, vector<16x64xf32>,
    return
  }
  func.func @transform_0(%arg0: i32, %arg1: i32) -> (i32, i32) {
    %c0_i32 = arith.constant 0 : i32
    %c0_i32_0 = arith.constant 0 : i32
    return %arg0, %c0_i32 : i32, i32
  }
  func.func @transform_1(%arg0: i32, %arg1: i32) -> (i32, i32) {
    %c0_i32 = arith.constant 0 : i32
    %c0_i32_0 = arith.constant 0 : i32
    %c0_i32_1 = arith.constant 0 : i32
    return %c0_i32, %c0_i32_0 : i32, i32
  }
  func.func @transform_2(%arg0: i32, %arg1: i32) -> (i32, i32) {
    %c0_i32 = arith.constant 0 : i32
    %c0_i32_0 = arith.constant 0 : i32
    %c0_i32_1 = arith.constant 0 : i32
    return %c0_i32, %c0_i32_0 : i32, i32
  }
  func.func @transform_3(%arg0: i32, %arg1: i32) -> (i32, i32) {
    %c0_i32 = arith.constant 0 : i32
    %c0_i32_0 = arith.constant 0 : i32
    return %c0_i32, %arg1 : i32, i32
  }
  func.func @transform_4(%arg0: i32, %arg1: i32) -> (i32, i32) {
    %c0_i32 = arith.constant 0 : i32
    %c0_i32_0 = arith.constant 0 : i32
    return %c0_i32, %arg1 : i32, i32
  }
  func.func @transform_5(%arg0: i32, %arg1: i32) -> (i32, i32) {
    %c0_i32 = arith.constant 0 : i32
    %c0_i32_0 = arith.constant 0 : i32
    %c0_i32_1 = arith.constant 0 : i32
    return %c0_i32, %c0_i32_0 : i32, i32
  }
  func.func @transform_6(%arg0: i32, %arg1: i32) -> (i32, i32) {
    %c0_i32 = arith.constant 0 : i32
    %c0_i32_0 = arith.constant 0 : i32
    %c0_i32_1 = arith.constant 0 : i32
    return %c0_i32, %c0_i32_0 : i32, i32
  }
  func.func @transform_7(%arg0: i32, %arg1: i32) -> (i32, i32) {
    %c0_i32 = arith.constant 0 : i32
    return %arg0, %arg1 : i32, i32
  }
}

module attributes {stable_mosaic.version = 11 : i64} {
  func.func @_fused_linear_kernel(%arg0: i32, %arg1: i32, %arg2: memref<32x64xf32, #tpu.memory_space<vmem>>, %arg3: memref<1x64xf32, #tpu.memory_space<vmem>>, %arg4: memref<1x64xf32, #tpu.memory_space<vmem>>, %arg5: memref<64x256xbf16, #tpu.memory_space<vmem>>, %arg6: memref<32x256xbf16, #tpu.memory_space<vmem>>) attributes {dimension_semantics = [#tpu.dimension_semantics<parallel>, #tpu.dimension_semantics<parallel>], iteration_bounds = array<i64: 1, 1>, scalar_prefetch = 0 : i64, scratch_operands = 0 : i64, tpu.core_type = #tpu.core_type<tc>, window_params = [{transform_indices = @transform_0, window_bounds = array<i64: 32, 64>}, {pipeline_mode = #tpu.pipeline_mode<synchronous>, transform_indices = @transform_1, window_bounds = array<i64: 1, 64>}, {pipeline_mode = #tpu.pipeline_mode<synchronous>, transform_indices = @transform_2, window_bounds = array<i64: 1, 64>}, {transform_indices = @transform_3, window_bounds = array<i64: 64, 256>}, {transform_indices = @transform_4, window_bounds = array<i64: 32, 256>}]} {
    %c0 = arith.constant 0 : index
    %c0_0 = arith.constant 0 : index
    %0 = vector.load %arg2[%c0, %c0_0] : memref<32x64xf32, #tpu.memory_space<vmem>>, vector<32x64xf32>
    %cst = arith.constant dense<0.000000e+00> : vector<32xf32>
    %1 = vector.multi_reduction <add>, %0, %cst [1] : vector<32x64xf32> to vector<32xf32>
    %2 = vector.shape_cast %1 : vector<32xf32> to vector<32x1xf32>
    %cst_1 = arith.constant 6.400000e+01 : f32
    %3 = vector.broadcast %cst_1 : f32 to vector<32x1xf32>
    %4 = arith.divf %2, %3 : vector<32x1xf32>
    %5 = vector.broadcast %4 : vector<32x1xf32> to vector<32x64xf32>
    %6 = arith.subf %0, %5 : vector<32x64xf32>
    %7 = arith.mulf %6, %6 : vector<32x64xf32>
    %cst_2 = arith.constant dense<0.000000e+00> : vector<32xf32>
    %8 = vector.multi_reduction <add>, %7, %cst_2 [1] : vector<32x64xf32> to vector<32xf32>
    %9 = vector.shape_cast %8 : vector<32xf32> to vector<32x1xf32>
    %cst_3 = arith.constant 6.400000e+01 : f32
    %10 = vector.broadcast %cst_3 : f32 to vector<32x1xf32>
    %11 = arith.divf %9, %10 : vector<32x1xf32>
    %12 = vector.broadcast %4 : vector<32x1xf32> to vector<32x64xf32>
    %13 = arith.subf %0, %12 : vector<32x64xf32>
    %cst_4 = arith.constant 9.99999974E-6 : f32
    %14 = vector.broadcast %cst_4 : f32 to vector<32x1xf32>
    %15 = arith.addf %11, %14 : vector<32x1xf32>
    %16 = math.rsqrt %15 : vector<32x1xf32>
    %17 = vector.broadcast %16 : vector<32x1xf32> to vector<32x64xf32>
    %18 = arith.mulf %13, %17 : vector<32x64xf32>
    %c0_5 = arith.constant 0 : index
    %c0_6 = arith.constant 0 : index
    %19 = vector.load %arg3[%c0_5, %c0_6] : memref<1x64xf32, #tpu.memory_space<vmem>>, vector<1x64xf32>
    %20 = vector.broadcast %19 : vector<1x64xf32> to vector<32x64xf32>
    %21 = arith.mulf %18, %20 : vector<32x64xf32>
    %c0_7 = arith.constant 0 : index
    %c0_8 = arith.constant 0 : index
    %22 = vector.load %arg4[%c0_7, %c0_8] : memref<1x64xf32, #tpu.memory_space<vmem>>, vector<1x64xf32>
    %23 = vector.broadcast %22 : vector<1x64xf32> to vector<32x64xf32>
    %24 = arith.addf %21, %23 : vector<32x64xf32>
    %25 = arith.truncf %24 : vector<32x64xf32> to vector<32x64xbf16>
    %c0_9 = arith.constant 0 : index
    %c0_10 = arith.constant 0 : index
    %26 = vector.load %arg5[%c0_9, %c0_10] : memref<64x256xbf16, #tpu.memory_space<vmem>>, vector<64x256xbf16>
    %cst_11 = arith.constant dense<0.000000e+00> : vector<32x256xf32>
    %27 = tpu.matmul %25, %26, %cst_11 {dimension_numbers = #tpu.dot_dimension_numbers<[1], [0], [0], [1], [0, 0, 1, 1], [], []>} : vector<32x64xbf16>, vector<64x256xbf16>, vector<32x256xf32> -> vector<32x256xf32>
    %28 = arith.truncf %27 : vector<32x256xf32> to vector<32x256xbf16>
    %c0_12 = arith.constant 0 : index
    %c0_13 = arith.constant 0 : index
    %29 = vector.load %arg6[%c0_12, %c0_13] : memref<32x256xbf16, #tpu.memory_space<vmem>>, vector<32x256xbf16>
    tpu.vector_store %arg6[%c0_12, %c0_13], %28 {strides = array<i32>} : memref<32x256xbf16, #tpu.memory_space<vmem>>, vector<32x256xbf16>,
    return
  }
  func.func @transform_0(%arg0: i32, %arg1: i32) -> (i32, i32) {
    %c0_i32 = arith.constant 0 : i32
    %c0_i32_0 = arith.constant 0 : i32
    return %arg0, %c0_i32 : i32, i32
  }
  func.func @transform_1(%arg0: i32, %arg1: i32) -> (i32, i32) {
    %c0_i32 = arith.constant 0 : i32
    %c0_i32_0 = arith.constant 0 : i32
    %c0_i32_1 = arith.constant 0 : i32
    return %c0_i32, %c0_i32_0 : i32, i32
  }
  func.func @transform_2(%arg0: i32, %arg1: i32) -> (i32, i32) {
    %c0_i32 = arith.constant 0 : i32
    %c0_i32_0 = arith.constant 0 : i32
    %c0_i32_1 = arith.constant 0 : i32
    return %c0_i32, %c0_i32_0 : i32, i32
  }
  func.func @transform_3(%arg0: i32, %arg1: i32) -> (i32, i32) {
    %c0_i32 = arith.constant 0 : i32
    %c0_i32_0 = arith.constant 0 : i32
    return %c0_i32, %arg1 : i32, i32
  }
  func.func @transform_4(%arg0: i32, %arg1: i32) -> (i32, i32) {
    %c0_i32 = arith.constant 0 : i32
    return %arg0, %arg1 : i32, i32
  }
}

module attributes {stable_mosaic.version = 11 : i64} {
  func.func @_flash_attn_kernel(%arg0: i32, %arg1: i32, %arg2: i32, %arg3: memref<1x16x128xbf16, #tpu.memory_space<vmem>>, %arg4: memref<1x16x128xbf16, #tpu.memory_space<vmem>>, %arg5: memref<1x16x128xbf16, #tpu.memory_space<vmem>>, %arg6: memref<1x16x128xbf16, #tpu.memory_space<vmem>>, %arg7: memref<16x1xf32, #tpu.memory_space<vmem>>, %arg8: memref<16x1xf32, #tpu.memory_space<vmem>>, %arg9: memref<16x128xf32, #tpu.memory_space<vmem>>) attributes {dimension_semantics = [#tpu.dimension_semantics<parallel>, #tpu.dimension_semantics<parallel>, #tpu.dimension_semantics<arbitrary>], iteration_bounds = array<i64: 8, 1, 1>, scalar_prefetch = 0 : i64, scratch_operands = 3 : i64, tpu.core_type = #tpu.core_type<tc>, window_params = [{transform_indices = @transform_0, window_bounds = array<i64: 1, 16, 128>}, {transform_indices = @transform_1, window_bounds = array<i64: 1, 16, 128>}, {transform_indices = @transform_2, window_bounds = array<i64: 1, 16, 128>}, {transform_indices = @transform_3, window_bounds = array<i64: 1, 16, 128>}]} {
    %c0_i32 = arith.constant 0 : i32
    %0 = arith.cmpi eq, %arg2, %c0_i32 : i32
    %1 = arith.extui %0 : i1 to i32
    %c0_i32_0 = arith.constant 0 : i32
    %2 = arith.cmpi ne, %1, %c0_i32_0 : i32
    scf.if %2 {
      %cst_28 = arith.constant -1.000000e+30 : f32
      %46 = vector.broadcast %cst_28 : f32 to vector<16x1xf32>
      %c0_29 = arith.constant 0 : index
      %c0_30 = arith.constant 0 : index
      %47 = vector.load %arg7[%c0_29, %c0_30] : memref<16x1xf32, #tpu.memory_space<vmem>>, vector<16x1xf32>
      tpu.vector_store %arg7[%c0_29, %c0_30], %46 {strides = array<i32>} : memref<16x1xf32, #tpu.memory_space<vmem>>, vector<16x1xf32>,
      %cst_31 = arith.constant 0.000000e+00 : f32
      %48 = vector.broadcast %cst_31 : f32 to vector<16x1xf32>
      %c0_32 = arith.constant 0 : index
      %c0_33 = arith.constant 0 : index
      %49 = vector.load %arg8[%c0_32, %c0_33] : memref<16x1xf32, #tpu.memory_space<vmem>>, vector<16x1xf32>
      tpu.vector_store %arg8[%c0_32, %c0_33], %48 {strides = array<i32>} : memref<16x1xf32, #tpu.memory_space<vmem>>, vector<16x1xf32>,
      %cst_34 = arith.constant 0.000000e+00 : f32
      %50 = vector.broadcast %cst_34 : f32 to vector<16x128xf32>
      %c0_35 = arith.constant 0 : index
      %c0_36 = arith.constant 0 : index
      %51 = vector.load %arg9[%c0_35, %c0_36] : memref<16x128xf32, #tpu.memory_space<vmem>>, vector<16x128xf32>
      tpu.vector_store %arg9[%c0_35, %c0_36], %50 {strides = array<i32>} : memref<16x128xf32, #tpu.memory_space<vmem>>, vector<16x128xf32>,
    } else {
    }
    %c0 = arith.constant 0 : index
    %c0_1 = arith.constant 0 : index
    %c0_2 = arith.constant 0 : index
    %3 = vector.load %arg3[%c0, %c0_1, %c0_2] : memref<1x16x128xbf16, #tpu.memory_space<vmem>>, vector<1x16x128xbf16>
    %4 = vector.shape_cast %3 : vector<1x16x128xbf16> to vector<16x128xbf16>
    %c0_3 = arith.constant 0 : index
    %c0_4 = arith.constant 0 : index
    %c0_5 = arith.constant 0 : index
    %5 = vector.load %arg4[%c0_3, %c0_4, %c0_5] : memref<1x16x128xbf16, #tpu.memory_space<vmem>>, vector<1x16x128xbf16>
    %6 = vector.shape_cast %5 : vector<1x16x128xbf16> to vector<16x128xbf16>
    %c0_6 = arith.constant 0 : index
    %c0_7 = arith.constant 0 : index
    %c0_8 = arith.constant 0 : index
    %7 = vector.load %arg5[%c0_6, %c0_7, %c0_8] : memref<1x16x128xbf16, #tpu.memory_space<vmem>>, vector<1x16x128xbf16>
    %8 = vector.shape_cast %7 : vector<1x16x128xbf16> to vector<16x128xbf16>
    %cst = arith.constant dense<0.000000e+00> : vector<16x16xf32>
    %9 = tpu.matmul %4, %6, %cst {dimension_numbers = #tpu.dot_dimension_numbers<[1], [1], [0], [0], [0, 0, 1, 0], [], []>} : vector<16x128xbf16>, vector<16x128xbf16>, vector<16x16xf32> -> vector<16x16xf32>
    %cst_9 = arith.constant 2.500000e-01 : f32
    %10 = vector.broadcast %cst_9 : f32 to vector<16x16xf32>
    %11 = arith.mulf %9, %10 : vector<16x16xf32>
    %c16_i32 = arith.constant 16 : i32
    %12 = arith.muli %arg2, %c16_i32 : i32
    %13 = tpu.iota {dimensions = array<i32: 1>} : vector<16x16xi32>
    %14 = vector.broadcast %12 : i32 to vector<16x16xi32>
    %15 = arith.addi %14, %13 : vector<16x16xi32>
    %c9_i32 = arith.constant 9 : i32
    %16 = vector.broadcast %c9_i32 : i32 to vector<16x16xi32>
    %17 = arith.cmpi slt, %15, %16 : vector<16x16xi32>
    %cst_10 = arith.constant -1.000000e+30 : f32
    %18 = vector.broadcast %cst_10 : f32 to vector<16x16xf32>
    %19 = arith.select %17, %11, %18 : vector<16x16xi1>, vector<16x16xf32>
    %c0_11 = arith.constant 0 : index
    %c0_12 = arith.constant 0 : index
    %20 = vector.load %arg7[%c0_11, %c0_12] : memref<16x1xf32, #tpu.memory_space<vmem>>, vector<16x1xf32>
    %cst_13 = arith.constant dense<0xFF800000> : vector<16xf32>
    %21 = vector.multi_reduction <maximumf>, %19, %cst_13 [1] : vector<16x16xf32> to vector<16xf32>
    %22 = vector.shape_cast %21 : vector<16xf32> to vector<16x1xf32>
    %23 = arith.maximumf %20, %22 : vector<16x1xf32>
    %24 = arith.subf %20, %23 : vector<16x1xf32>
    %25 = math.exp %24 : vector<16x1xf32>
    %26 = vector.broadcast %23 : vector<16x1xf32> to vector<16x16xf32>
    %27 = arith.subf %19, %26 : vector<16x16xf32>
    %28 = math.exp %27 : vector<16x16xf32>
    %c0_14 = arith.constant 0 : index
    %c0_15 = arith.constant 0 : index
    %29 = vector.load %arg8[%c0_14, %c0_15] : memref<16x1xf32, #tpu.memory_space<vmem>>, vector<16x1xf32>
    %30 = arith.mulf %25, %29 : vector<16x1xf32>
    %cst_16 = arith.constant dense<0.000000e+00> : vector<16xf32>
    %31 = vector.multi_reduction <add>, %28, %cst_16 [1] : vector<16x16xf32> to vector<16xf32>
    %32 = vector.shape_cast %31 : vector<16xf32> to vector<16x1xf32>
    %33 = arith.addf %30, %32 : vector<16x1xf32>
    %c0_17 = arith.constant 0 : index
    %c0_18 = arith.constant 0 : index
    %34 = vector.load %arg8[%c0_17, %c0_18] : memref<16x1xf32, #tpu.memory_space<vmem>>, vector<16x1xf32>
    tpu.vector_store %arg8[%c0_17, %c0_18], %33 {strides = array<i32>} : memref<16x1xf32, #tpu.memory_space<vmem>>, vector<16x1xf32>,
    %c0_19 = arith.constant 0 : index
    %c0_20 = arith.constant 0 : index
    %35 = vector.load %arg9[%c0_19, %c0_20] : memref<16x128xf32, #tpu.memory_space<vmem>>, vector<16x128xf32>
    %36 = vector.broadcast %25 : vector<16x1xf32> to vector<16x128xf32>
    %37 = arith.mulf %36, %35 : vector<16x128xf32>
    %38 = arith.truncf %28 : vector<16x16xf32> to vector<16x16xbf16>
    %cst_21 = arith.constant dense<0.000000e+00> : vector<16x128xf32>
    %39 = tpu.matmul %38, %8, %cst_21 {dimension_numbers = #tpu.dot_dimension_numbers<[1], [0], [0], [1], [0, 0, 1, 1], [], []>} : vector<16x16xbf16>, vector<16x128xbf16>, vector<16x128xf32> -> vector<16x128xf32>
    %40 = arith.addf %37, %39 : vector<16x128xf32>
    %c0_22 = arith.constant 0 : index
    %c0_23 = arith.constant 0 : index
    %41 = vector.load %arg9[%c0_22, %c0_23] : memref<16x128xf32, #tpu.memory_space<vmem>>, vector<16x128xf32>
    tpu.vector_store %arg9[%c0_22, %c0_23], %40 {strides = array<i32>} : memref<16x128xf32, #tpu.memory_space<vmem>>, vector<16x128xf32>,
    %c0_24 = arith.constant 0 : index
    %c0_25 = arith.constant 0 : index
    %42 = vector.load %arg7[%c0_24, %c0_25] : memref<16x1xf32, #tpu.memory_space<vmem>>, vector<16x1xf32>
    tpu.vector_store %arg7[%c0_24, %c0_25], %23 {strides = array<i32>} : memref<16x1xf32, #tpu.memory_space<vmem>>, vector<16x1xf32>,
    %c0_i32_26 = arith.constant 0 : i32
    %43 = arith.cmpi eq, %arg2, %c0_i32_26 : i32
    %44 = arith.extui %43 : i1 to i32
    %c0_i32_27 = arith.constant 0 : i32
    %45 = arith.cmpi ne, %44, %c0_i32_27 : i32
    scf.if %45 {
      %c0_28 = arith.constant 0 : index
      %c0_29 = arith.constant 0 : index
      %46 = vector.load %arg9[%c0_28, %c0_29] : memref<16x128xf32, #tpu.memory_space<vmem>>, vector<16x128xf32>
      %c0_30 = arith.constant 0 : index
      %c0_31 = arith.constant 0 : index
      %47 = vector.load %arg8[%c0_30, %c0_31] : memref<16x1xf32, #tpu.memory_space<vmem>>, vector<16x1xf32>
      %48 = tpu.reciprocal %47 {approx = true} : vector<16x1xf32> -> vector<16x1xf32>
      %49 = vector.broadcast %48 : vector<16x1xf32> to vector<16x128xf32>
      %50 = arith.mulf %46, %49 : vector<16x128xf32>
      %51 = arith.truncf %50 : vector<16x128xf32> to vector<16x128xbf16>
      %c0_32 = arith.constant 0 : index
      %c0_33 = arith.constant 0 : index
      %c0_34 = arith.constant 0 : index
      %52 = vector.load %arg6[%c0_32, %c0_33, %c0_34] : memref<1x16x128xbf16, #tpu.memory_space<vmem>>, vector<1x16x128xbf16>
      %53 = vector.shape_cast %52 : vector<1x16x128xbf16> to vector<16x128xbf16>
      %54 = vector.shape_cast %51 : vector<16x128xbf16> to vector<1x16x128xbf16>
      tpu.vector_store %arg6[%c0_32, %c0_33, %c0_34], %54 {strides = array<i32>} : memref<1x16x128xbf16, #tpu.memory_space<vmem>>, vector<1x16x128xbf16>,
    } else {
    }
    return
  }
  func.func @transform_0(%arg0: i32, %arg1: i32, %arg2: i32) -> (i32, i32, i32) {
    %c0_i32 = arith.constant 0 : i32
    %c0_i32_0 = arith.constant 0 : i32
    return %arg0, %arg1, %c0_i32 : i32, i32, i32
  }
  func.func @transform_1(%arg0: i32, %arg1: i32, %arg2: i32) -> (i32, i32, i32) {
    %c0_i32 = arith.constant 0 : i32
    %c0_i32_0 = arith.constant 0 : i32
    return %arg0, %arg2, %c0_i32 : i32, i32, i32
  }
  func.func @transform_2(%arg0: i32, %arg1: i32, %arg2: i32) -> (i32, i32, i32) {
    %c0_i32 = arith.constant 0 : i32
    %c0_i32_0 = arith.constant 0 : i32
    return %arg0, %arg2, %c0_i32 : i32, i32, i32
  }
  func.func @transform_3(%arg0: i32, %arg1: i32, %arg2: i32) -> (i32, i32, i32) {
    %c0_i32 = arith.constant 0 : i32
    %c0_i32_0 = arith.constant 0 : i32
    return %arg0, %arg1, %c0_i32 : i32, i32, i32
  }
}

module attributes {stable_mosaic.version = 11 : i64} {
  func.func @_fused_linear_kernel(%arg0: i32, %arg1: i32, %arg2: memref<32x64xbf16, #tpu.memory_space<vmem>>, %arg3: memref<64x128xbf16, #tpu.memory_space<vmem>>, %arg4: memref<1x128xf32, #tpu.memory_space<vmem>>, %arg5: memref<32x128xf32, #tpu.memory_space<vmem>>, %arg6: memref<32x128xf32, #tpu.memory_space<vmem>>) attributes {dimension_semantics = [#tpu.dimension_semantics<parallel>, #tpu.dimension_semantics<parallel>], iteration_bounds = array<i64: 1, 1>, scalar_prefetch = 0 : i64, scratch_operands = 0 : i64, tpu.core_type = #tpu.core_type<tc>, window_params = [{transform_indices = @transform_0, window_bounds = array<i64: 32, 64>}, {transform_indices = @transform_1, window_bounds = array<i64: 64, 128>}, {transform_indices = @transform_2, window_bounds = array<i64: 1, 128>}, {transform_indices = @transform_3, window_bounds = array<i64: 32, 128>}, {transform_indices = @transform_4, window_bounds = array<i64: 32, 128>}]} {
    %c0 = arith.constant 0 : index
    %c0_0 = arith.constant 0 : index
    %0 = vector.load %arg2[%c0, %c0_0] : memref<32x64xbf16, #tpu.memory_space<vmem>>, vector<32x64xbf16>
    %c0_1 = arith.constant 0 : index
    %c0_2 = arith.constant 0 : index
    %1 = vector.load %arg3[%c0_1, %c0_2] : memref<64x128xbf16, #tpu.memory_space<vmem>>, vector<64x128xbf16>
    %cst = arith.constant dense<0.000000e+00> : vector<32x128xf32>
    %2 = tpu.matmul %0, %1, %cst {dimension_numbers = #tpu.dot_dimension_numbers<[1], [0], [0], [1], [0, 0, 1, 1], [], []>} : vector<32x64xbf16>, vector<64x128xbf16>, vector<32x128xf32> -> vector<32x128xf32>
    %c0_3 = arith.constant 0 : index
    %c0_4 = arith.constant 0 : index
    %3 = vector.load %arg4[%c0_3, %c0_4] : memref<1x128xf32, #tpu.memory_space<vmem>>, vector<1x128xf32>
    %4 = vector.broadcast %3 : vector<1x128xf32> to vector<32x128xf32>
    %5 = arith.addf %2, %4 : vector<32x128xf32>
    %c0_5 = arith.constant 0 : index
    %c0_6 = arith.constant 0 : index
    %6 = vector.load %arg5[%c0_5, %c0_6] : memref<32x128xf32, #tpu.memory_space<vmem>>, vector<32x128xf32>
    %7 = arith.addf %5, %6 : vector<32x128xf32>
    %c0_7 = arith.constant 0 : index
    %c0_8 = arith.constant 0 : index
    %8 = vector.load %arg6[%c0_7, %c0_8] : memref<32x128xf32, #tpu.memory_space<vmem>>, vector<32x128xf32>
    tpu.vector_store %arg6[%c0_7, %c0_8], %7 {strides = array<i32>} : memref<32x128xf32, #tpu.memory_space<vmem>>, vector<32x128xf32>,
    return
  }
  func.func @transform_0(%arg0: i32, %arg1: i32) -> (i32, i32) {
    %c0_i32 = arith.constant 0 : i32
    %c0_i32_0 = arith.constant 0 : i32
    return %arg0, %c0_i32 : i32, i32
  }
  func.func @transform_1(%arg0: i32, %arg1: i32) -> (i32, i32) {
    %c0_i32 = arith.constant 0 : i32
    %c0_i32_0 = arith.constant 0 : i32
    return %c0_i32, %arg1 : i32, i32
  }
  func.func @transform_2(%arg0: i32, %arg1: i32) -> (i32, i32) {
    %c0_i32 = arith.constant 0 : i32
    %c0_i32_0 = arith.constant 0 : i32
    return %c0_i32, %arg1 : i32, i32
  }
  func.func @transform_3(%arg0: i32, %arg1: i32) -> (i32, i32) {
    %c0_i32 = arith.constant 0 : i32
    return %arg0, %arg1 : i32, i32
  }
  func.func @transform_4(%arg0: i32, %arg1: i32) -> (i32, i32) {
    %c0_i32 = arith.constant 0 : i32
    return %arg0, %arg1 : i32, i32
  }
}

module attributes {stable_mosaic.version = 11 : i64} {
  func.func @_fused_linear_kernel(%arg0: i32, %arg1: i32, %arg2: memref<32x64xf32, #tpu.memory_space<vmem>>, %arg3: memref<1x64xf32, #tpu.memory_space<vmem>>, %arg4: memref<1x64xf32, #tpu.memory_space<vmem>>, %arg5: memref<64x128xbf16, #tpu.memory_space<vmem>>, %arg6: memref<1x128xf32, #tpu.memory_space<vmem>>, %arg7: memref<32x128xbf16, #tpu.memory_space<vmem>>) attributes {dimension_semantics = [#tpu.dimension_semantics<parallel>, #tpu.dimension_semantics<parallel>], iteration_bounds = array<i64: 1, 1>, scalar_prefetch = 0 : i64, scratch_operands = 0 : i64, tpu.core_type = #tpu.core_type<tc>, window_params = [{transform_indices = @transform_0, window_bounds = array<i64: 32, 64>}, {pipeline_mode = #tpu.pipeline_mode<synchronous>, transform_indices = @transform_1, window_bounds = array<i64: 1, 64>}, {pipeline_mode = #tpu.pipeline_mode<synchronous>, transform_indices = @transform_2, window_bounds = array<i64: 1, 64>}, {transform_indices = @transform_3, window_bounds = array<i64: 64, 128>}, {transform_indices = @transform_4, window_bounds = array<i64: 1, 128>}, {transform_indices = @transform_5, window_bounds = array<i64: 32, 128>}]} {
    %c0 = arith.constant 0 : index
    %c0_0 = arith.constant 0 : index
    %0 = vector.load %arg2[%c0, %c0_0] : memref<32x64xf32, #tpu.memory_space<vmem>>, vector<32x64xf32>
    %cst = arith.constant dense<0.000000e+00> : vector<32xf32>
    %1 = vector.multi_reduction <add>, %0, %cst [1] : vector<32x64xf32> to vector<32xf32>
    %2 = vector.shape_cast %1 : vector<32xf32> to vector<32x1xf32>
    %cst_1 = arith.constant 6.400000e+01 : f32
    %3 = vector.broadcast %cst_1 : f32 to vector<32x1xf32>
    %4 = arith.divf %2, %3 : vector<32x1xf32>
    %5 = vector.broadcast %4 : vector<32x1xf32> to vector<32x64xf32>
    %6 = arith.subf %0, %5 : vector<32x64xf32>
    %7 = arith.mulf %6, %6 : vector<32x64xf32>
    %cst_2 = arith.constant dense<0.000000e+00> : vector<32xf32>
    %8 = vector.multi_reduction <add>, %7, %cst_2 [1] : vector<32x64xf32> to vector<32xf32>
    %9 = vector.shape_cast %8 : vector<32xf32> to vector<32x1xf32>
    %cst_3 = arith.constant 6.400000e+01 : f32
    %10 = vector.broadcast %cst_3 : f32 to vector<32x1xf32>
    %11 = arith.divf %9, %10 : vector<32x1xf32>
    %12 = vector.broadcast %4 : vector<32x1xf32> to vector<32x64xf32>
    %13 = arith.subf %0, %12 : vector<32x64xf32>
    %cst_4 = arith.constant 9.99999974E-6 : f32
    %14 = vector.broadcast %cst_4 : f32 to vector<32x1xf32>
    %15 = arith.addf %11, %14 : vector<32x1xf32>
    %16 = math.rsqrt %15 : vector<32x1xf32>
    %17 = vector.broadcast %16 : vector<32x1xf32> to vector<32x64xf32>
    %18 = arith.mulf %13, %17 : vector<32x64xf32>
    %c0_5 = arith.constant 0 : index
    %c0_6 = arith.constant 0 : index
    %19 = vector.load %arg3[%c0_5, %c0_6] : memref<1x64xf32, #tpu.memory_space<vmem>>, vector<1x64xf32>
    %20 = vector.broadcast %19 : vector<1x64xf32> to vector<32x64xf32>
    %21 = arith.mulf %18, %20 : vector<32x64xf32>
    %c0_7 = arith.constant 0 : index
    %c0_8 = arith.constant 0 : index
    %22 = vector.load %arg4[%c0_7, %c0_8] : memref<1x64xf32, #tpu.memory_space<vmem>>, vector<1x64xf32>
    %23 = vector.broadcast %22 : vector<1x64xf32> to vector<32x64xf32>
    %24 = arith.addf %21, %23 : vector<32x64xf32>
    %25 = arith.truncf %24 : vector<32x64xf32> to vector<32x64xbf16>
    %c0_9 = arith.constant 0 : index
    %c0_10 = arith.constant 0 : index
    %26 = vector.load %arg5[%c0_9, %c0_10] : memref<64x128xbf16, #tpu.memory_space<vmem>>, vector<64x128xbf16>
    %cst_11 = arith.constant dense<0.000000e+00> : vector<32x128xf32>
    %27 = tpu.matmul %25, %26, %cst_11 {dimension_numbers = #tpu.dot_dimension_numbers<[1], [0], [0], [1], [0, 0, 1, 1], [], []>} : vector<32x64xbf16>, vector<64x128xbf16>, vector<32x128xf32> -> vector<32x128xf32>
    %c0_12 = arith.constant 0 : index
    %c0_13 = arith.constant 0 : index
    %28 = vector.load %arg6[%c0_12, %c0_13] : memref<1x128xf32, #tpu.memory_space<vmem>>, vector<1x128xf32>
    %29 = vector.broadcast %28 : vector<1x128xf32> to vector<32x128xf32>
    %30 = arith.addf %27, %29 : vector<32x128xf32>
    %cst_14 = arith.constant 5.000000e-01 : f32
    %31 = vector.broadcast %cst_14 : f32 to vector<32x128xf32>
    %32 = arith.mulf %31, %30 : vector<32x128xf32>
    %cst_15 = arith.constant 4.471500e-02 : f32
    %33 = vector.broadcast %cst_15 : f32 to vector<32x128xf32>
    %34 = arith.mulf %33, %30 : vector<32x128xf32>
    %35 = arith.mulf %34, %30 : vector<32x128xf32>
    %36 = arith.mulf %35, %30 : vector<32x128xf32>
    %37 = arith.addf %30, %36 : vector<32x128xf32>
    %cst_16 = arith.constant 0.797884583 : f32
    %38 = vector.broadcast %cst_16 : f32 to vector<32x128xf32>
    %39 = arith.mulf %38, %37 : vector<32x128xf32>
    %40 = math.tanh %39 : vector<32x128xf32>
    %cst_17 = arith.constant 1.000000e+00 : f32
    %41 = vector.broadcast %cst_17 : f32 to vector<32x128xf32>
    %42 = arith.addf %41, %40 : vector<32x128xf32>
    %43 = arith.mulf %32, %42 : vector<32x128xf32>
    %44 = arith.truncf %43 : vector<32x128xf32> to vector<32x128xbf16>
    %c0_18 = arith.constant 0 : index
    %c0_19 = arith.constant 0 : index
    %45 = vector.load %arg7[%c0_18, %c0_19] : memref<32x128xbf16, #tpu.memory_space<vmem>>, vector<32x128xbf16>
    tpu.vector_store %arg7[%c0_18, %c0_19], %44 {strides = array<i32>} : memref<32x128xbf16, #tpu.memory_space<vmem>>, vector<32x128xbf16>,
    return
  }
  func.func @transform_0(%arg0: i32, %arg1: i32) -> (i32, i32) {
    %c0_i32 = arith.constant 0 : i32
    %c0_i32_0 = arith.constant 0 : i32
    return %arg0, %c0_i32 : i32, i32
  }
  func.func @transform_1(%arg0: i32, %arg1: i32) -> (i32, i32) {
    %c0_i32 = arith.constant 0 : i32
    %c0_i32_0 = arith.constant 0 : i32
    %c0_i32_1 = arith.constant 0 : i32
    return %c0_i32, %c0_i32_0 : i32, i32
  }
  func.func @transform_2(%arg0: i32, %arg1: i32) -> (i32, i32) {
    %c0_i32 = arith.constant 0 : i32
    %c0_i32_0 = arith.constant 0 : i32
    %c0_i32_1 = arith.constant 0 : i32
    return %c0_i32, %c0_i32_0 : i32, i32
  }
  func.func @transform_3(%arg0: i32, %arg1: i32) -> (i32, i32) {
    %c0_i32 = arith.constant 0 : i32
    %c0_i32_0 = arith.constant 0 : i32
    return %c0_i32, %arg1 : i32, i32
  }
  func.func @transform_4(%arg0: i32, %arg1: i32) -> (i32, i32) {
    %c0_i32 = arith.constant 0 : i32
    %c0_i32_0 = arith.constant 0 : i32
    return %c0_i32, %arg1 : i32, i32
  }
  func.func @transform_5(%arg0: i32, %arg1: i32) -> (i32, i32) {
    %c0_i32 = arith.constant 0 : i32
    return %arg0, %arg1 : i32, i32
  }
}

module attributes {stable_mosaic.version = 11 : i64} {
  func.func @_fused_linear_kernel(%arg0: i32, %arg1: i32, %arg2: memref<32x128xbf16, #tpu.memory_space<vmem>>, %arg3: memref<128x128xbf16, #tpu.memory_space<vmem>>, %arg4: memref<1x128xf32, #tpu.memory_space<vmem>>, %arg5: memref<32x128xf32, #tpu.memory_space<vmem>>, %arg6: memref<32x128xf32, #tpu.memory_space<vmem>>) attributes {dimension_semantics = [#tpu.dimension_semantics<parallel>, #tpu.dimension_semantics<parallel>], iteration_bounds = array<i64: 1, 1>, scalar_prefetch = 0 : i64, scratch_operands = 0 : i64, tpu.core_type = #tpu.core_type<tc>, window_params = [{transform_indices = @transform_0, window_bounds = array<i64: 32, 128>}, {transform_indices = @transform_1, window_bounds = array<i64: 128, 128>}, {transform_indices = @transform_2, window_bounds = array<i64: 1, 128>}, {transform_indices = @transform_3, window_bounds = array<i64: 32, 128>}, {transform_indices = @transform_4, window_bounds = array<i64: 32, 128>}]} {
    %c0 = arith.constant 0 : index
    %c0_0 = arith.constant 0 : index
    %0 = vector.load %arg2[%c0, %c0_0] : memref<32x128xbf16, #tpu.memory_space<vmem>>, vector<32x128xbf16>
    %c0_1 = arith.constant 0 : index
    %c0_2 = arith.constant 0 : index
    %1 = vector.load %arg3[%c0_1, %c0_2] : memref<128x128xbf16, #tpu.memory_space<vmem>>, vector<128x128xbf16>
    %cst = arith.constant dense<0.000000e+00> : vector<32x128xf32>
    %2 = tpu.matmul %0, %1, %cst {dimension_numbers = #tpu.dot_dimension_numbers<[1], [0], [0], [1], [0, 0, 1, 1], [], []>} : vector<32x128xbf16>, vector<128x128xbf16>, vector<32x128xf32> -> vector<32x128xf32>
    %c0_3 = arith.constant 0 : index
    %c0_4 = arith.constant 0 : index
    %3 = vector.load %arg4[%c0_3, %c0_4] : memref<1x128xf32, #tpu.memory_space<vmem>>, vector<1x128xf32>
    %4 = vector.broadcast %3 : vector<1x128xf32> to vector<32x128xf32>
    %5 = arith.addf %2, %4 : vector<32x128xf32>
    %c0_5 = arith.constant 0 : index
    %c0_6 = arith.constant 0 : index
    %6 = vector.load %arg5[%c0_5, %c0_6] : memref<32x128xf32, #tpu.memory_space<vmem>>, vector<32x128xf32>
    %7 = arith.addf %5, %6 : vector<32x128xf32>
    %c0_7 = arith.constant 0 : index
    %c0_8 = arith.constant 0 : index
    %8 = vector.load %arg6[%c0_7, %c0_8] : memref<32x128xf32, #tpu.memory_space<vmem>>, vector<32x128xf32>
    tpu.vector_store %arg6[%c0_7, %c0_8], %7 {strides = array<i32>} : memref<32x128xf32, #tpu.memory_space<vmem>>, vector<32x128xf32>,
    return
  }
  func.func @transform_0(%arg0: i32, %arg1: i32) -> (i32, i32) {
    %c0_i32 = arith.constant 0 : i32
    %c0_i32_0 = arith.constant 0 : i32
    return %arg0, %c0_i32 : i32, i32
  }
  func.func @transform_1(%arg0: i32, %arg1: i32) -> (i32, i32) {
    %c0_i32 = arith.constant 0 : i32
    %c0_i32_0 = arith.constant 0 : i32
    return %c0_i32, %arg1 : i32, i32
  }
  func.func @transform_2(%arg0: i32, %arg1: i32) -> (i32, i32) {
    %c0_i32 = arith.constant 0 : i32
    %c0_i32_0 = arith.constant 0 : i32
    return %c0_i32, %arg1 : i32, i32
  }
  func.func @transform_3(%arg0: i32, %arg1: i32) -> (i32, i32) {
    %c0_i32 = arith.constant 0 : i32
    return %arg0, %arg1 : i32, i32
  }
  func.func @transform_4(%arg0: i32, %arg1: i32) -> (i32, i32) {
    %c0_i32 = arith.constant 0 : i32
    return %arg0, %arg1 : i32, i32
  }
}

module attributes {stable_mosaic.version = 11 : i64} {
  func.func @_fused_linear_kernel(%arg0: i32, %arg1: i32, %arg2: memref<16x64xf32, #tpu.memory_space<vmem>>, %arg3: memref<1x64xf32, #tpu.memory_space<vmem>>, %arg4: memref<1x64xf32, #tpu.memory_space<vmem>>, %arg5: memref<64x128xbf16, #tpu.memory_space<vmem>>, %arg6: memref<1x128xf32, #tpu.memory_space<vmem>>, %arg7: memref<16x128xf32, #tpu.memory_space<vmem>>) attributes {dimension_semantics = [#tpu.dimension_semantics<parallel>, #tpu.dimension_semantics<parallel>], iteration_bounds = array<i64: 1, 1>, scalar_prefetch = 0 : i64, scratch_operands = 0 : i64, tpu.core_type = #tpu.core_type<tc>, window_params = [{transform_indices = @transform_0, window_bounds = array<i64: 16, 64>}, {pipeline_mode = #tpu.pipeline_mode<synchronous>, transform_indices = @transform_1, window_bounds = array<i64: 1, 64>}, {pipeline_mode = #tpu.pipeline_mode<synchronous>, transform_indices = @transform_2, window_bounds = array<i64: 1, 64>}, {transform_indices = @transform_3, window_bounds = array<i64: 64, 128>}, {transform_indices = @transform_4, window_bounds = array<i64: 1, 128>}, {transform_indices = @transform_5, window_bounds = array<i64: 16, 128>}]} {
    %c0 = arith.constant 0 : index
    %c0_0 = arith.constant 0 : index
    %0 = vector.load %arg2[%c0, %c0_0] : memref<16x64xf32, #tpu.memory_space<vmem>>, vector<16x64xf32>
    %cst = arith.constant dense<0.000000e+00> : vector<16xf32>
    %1 = vector.multi_reduction <add>, %0, %cst [1] : vector<16x64xf32> to vector<16xf32>
    %2 = vector.shape_cast %1 : vector<16xf32> to vector<16x1xf32>
    %cst_1 = arith.constant 6.400000e+01 : f32
    %3 = vector.broadcast %cst_1 : f32 to vector<16x1xf32>
    %4 = arith.divf %2, %3 : vector<16x1xf32>
    %5 = vector.broadcast %4 : vector<16x1xf32> to vector<16x64xf32>
    %6 = arith.subf %0, %5 : vector<16x64xf32>
    %7 = arith.mulf %6, %6 : vector<16x64xf32>
    %cst_2 = arith.constant dense<0.000000e+00> : vector<16xf32>
    %8 = vector.multi_reduction <add>, %7, %cst_2 [1] : vector<16x64xf32> to vector<16xf32>
    %9 = vector.shape_cast %8 : vector<16xf32> to vector<16x1xf32>
    %cst_3 = arith.constant 6.400000e+01 : f32
    %10 = vector.broadcast %cst_3 : f32 to vector<16x1xf32>
    %11 = arith.divf %9, %10 : vector<16x1xf32>
    %12 = vector.broadcast %4 : vector<16x1xf32> to vector<16x64xf32>
    %13 = arith.subf %0, %12 : vector<16x64xf32>
    %cst_4 = arith.constant 9.99999974E-6 : f32
    %14 = vector.broadcast %cst_4 : f32 to vector<16x1xf32>
    %15 = arith.addf %11, %14 : vector<16x1xf32>
    %16 = math.rsqrt %15 : vector<16x1xf32>
    %17 = vector.broadcast %16 : vector<16x1xf32> to vector<16x64xf32>
    %18 = arith.mulf %13, %17 : vector<16x64xf32>
    %c0_5 = arith.constant 0 : index
    %c0_6 = arith.constant 0 : index
    %19 = vector.load %arg3[%c0_5, %c0_6] : memref<1x64xf32, #tpu.memory_space<vmem>>, vector<1x64xf32>
    %20 = vector.broadcast %19 : vector<1x64xf32> to vector<16x64xf32>
    %21 = arith.mulf %18, %20 : vector<16x64xf32>
    %c0_7 = arith.constant 0 : index
    %c0_8 = arith.constant 0 : index
    %22 = vector.load %arg4[%c0_7, %c0_8] : memref<1x64xf32, #tpu.memory_space<vmem>>, vector<1x64xf32>
    %23 = vector.broadcast %22 : vector<1x64xf32> to vector<16x64xf32>
    %24 = arith.addf %21, %23 : vector<16x64xf32>
    %25 = arith.truncf %24 : vector<16x64xf32> to vector<16x64xbf16>
    %c0_9 = arith.constant 0 : index
    %c0_10 = arith.constant 0 : index
    %26 = vector.load %arg5[%c0_9, %c0_10] : memref<64x128xbf16, #tpu.memory_space<vmem>>, vector<64x128xbf16>
    %cst_11 = arith.constant dense<0.000000e+00> : vector<16x128xf32>
    %27 = tpu.matmul %25, %26, %cst_11 {dimension_numbers = #tpu.dot_dimension_numbers<[1], [0], [0], [1], [0, 0, 1, 1], [], []>} : vector<16x64xbf16>, vector<64x128xbf16>, vector<16x128xf32> -> vector<16x128xf32>
    %c0_12 = arith.constant 0 : index
    %c0_13 = arith.constant 0 : index
    %28 = vector.load %arg6[%c0_12, %c0_13] : memref<1x128xf32, #tpu.memory_space<vmem>>, vector<1x128xf32>
    %29 = vector.broadcast %28 : vector<1x128xf32> to vector<16x128xf32>
    %30 = arith.addf %27, %29 : vector<16x128xf32>
    %c0_14 = arith.constant 0 : index
    %c0_15 = arith.constant 0 : index
    %31 = vector.load %arg7[%c0_14, %c0_15] : memref<16x128xf32, #tpu.memory_space<vmem>>, vector<16x128xf32>
    tpu.vector_store %arg7[%c0_14, %c0_15], %30 {strides = array<i32>} : memref<16x128xf32, #tpu.memory_space<vmem>>, vector<16x128xf32>,
    return
  }
  func.func @transform_0(%arg0: i32, %arg1: i32) -> (i32, i32) {
    %c0_i32 = arith.constant 0 : i32
    %c0_i32_0 = arith.constant 0 : i32
    return %arg0, %c0_i32 : i32, i32
  }
  func.func @transform_1(%arg0: i32, %arg1: i32) -> (i32, i32) {
    %c0_i32 = arith.constant 0 : i32
    %c0_i32_0 = arith.constant 0 : i32
    %c0_i32_1 = arith.constant 0 : i32
    return %c0_i32, %c0_i32_0 : i32, i32
  }
  func.func @transform_2(%arg0: i32, %arg1: i32) -> (i32, i32) {
    %c0_i32 = arith.constant 0 : i32
    %c0_i32_0 = arith.constant 0 : i32
    %c0_i32_1 = arith.constant 0 : i32
    return %c0_i32, %c0_i32_0 : i32, i32
  }
  func.func @transform_3(%arg0: i32, %arg1: i32) -> (i32, i32) {
    %c0_i32 = arith.constant 0 : i32
    %c0_i32_0 = arith.constant 0 : i32
    return %c0_i32, %arg1 : i32, i32
  }
  func.func @transform_4(%arg0: i32, %arg1: i32) -> (i32, i32) {
    %c0_i32 = arith.constant 0 : i32
    %c0_i32_0 = arith.constant 0 : i32
    return %c0_i32, %arg1 : i32, i32
  }
  func.func @transform_5(%arg0: i32, %arg1: i32) -> (i32, i32) {
    %c0_i32 = arith.constant 0 : i32
    return %arg0, %arg1 : i32, i32
  }
}

</mosaic_0001>

<bundles_post_ra>
// kernel: vit_enc_forward.12
= control target key start
LH: loop header
LB: loop body
LE: loop exit
PB: predicated region body
PF: predicated region fallthrough
CT: control target
= control target key end

     0   :  { %vm31_vm0 = vcmask 523264   ;;  %v338_v8 = vmov 0   ;;  %v71_v41 = vlaneseq  ;;  %s459_s0 = inlined_call_operand.vmem [shape: f32[16,192], index: 0, kind: input, shape index: {}]   ;;  %s460_s3 = inlined_call_operand.vmem [shape: bf16[192,64], index: 3, kind: input, shape index: {}]   ;;  %s461_s1 = inlined_call_operand.vmem [shape: f32[1,192], index: 1, kind: input, shape index: {}]   ;;  %s462_s2 = inlined_call_operand.vmem [shape: f32[1,192], index: 2, kind: input, shape index: {}]   ;;  %s463_s4 = inlined_call_operand.vmem [shape: f32[1,64], index: 4, kind: input, shape index: {}]   ;;  %s464_s5 = inlined_call_operand.vmem [shape: f32[1,64], index: 5, kind: input, shape index: {}]   ;;  %s465_s6 = inlined_call_operand.vmem [shape: f32[1,64], index: 6, kind: input, shape index: {}]   ;;  %s466_s7 = inlined_call_operand.vmem [shape: f32[16,64], index: 7, kind: output, shape index: {}]  }
   0x1   :  { %v27_v0 = vld [vmem:[%s459_s0] sm:$0xff]  ;;  %v28_v1 = vld [vmem:[%s459_s0 + $0x8] sm:$0xff]  ;;  %v29_v3 = vld [vmem:[%s459_s0 + $0x10] sm:$0xff]  ;;  %209 = vmatprep.subr.bf16.mxu0 %v338_v8 }
   0x2   :  { %v32_v2 = vsel %vm31_vm0, %v28_v1, 0.0  ;;  %v30_v4 = vld [vmem:[%s459_s0 + $0x18] sm:$0xff]  ;;  %v318_v9 = vld [vmem:[%s460_s3] sm:$0xff]   ;;  %v319_v10 = vld [vmem:[%s460_s3 + $0x8] sm:$0xff]   ;;  %v72_v44 = vshrl.u32 %v71_v41, 7 }
   0x3   :  { %v33_v5 = vadd.f32 %v32_v2, %v27_v0  ;;  %v36_v6 = vsel %vm31_vm0, %v30_v4, 0.0  ;;  %210 = vmatpush1.bf16.msra.mxu0 %v318_v9  ;;  %v320_v11 = vld [vmem:[%s460_s3 + $0x10] sm:$0xff]   ;;  %v321_v12 = vld [vmem:[%s460_s3 + $0x18] sm:$0xff]   ;;  %v322_v13 = vld [vmem:[%s460_s3 + $0x20] sm:$0xff]  }
   0x4   :  { %v37_v7 = vadd.f32 %v36_v6, %v29_v3  ;;  %211 = vmatprep.subr.bf16.mxu0 %v338_v8  ;;  %v323_v30 = vld [vmem:[%s460_s3 + $0x28] sm:$0xff]   ;;  %v324_v31 = vld [vmem:[%s460_s3 + $0x30] sm:$0xff]   ;;  %v325_v32 = vld [vmem:[%s460_s3 + $0x38] sm:$0xff]   ;;  %v73_v45 = vsub.s32 0, %v72_v44  ;;  %v77_v46 = vsub.s32 1, %v72_v44 }
   0x5   :  { %34 = vadd.xlane.f32.xlu0 %v33_v5  ;;  %v326_v33 = vld [vmem:[%s460_s3 + $0x40] sm:$0xff]   ;;  %v327_v34 = vld [vmem:[%s460_s3 + $0x48] sm:$0xff]   ;;  %v328_v35 = vld [vmem:[%s460_s3 + $0x50] sm:$0xff]  }
   0x6   :  { %v329_v36 = vld [vmem:[%s460_s3 + $0x58] sm:$0xff]   ;;  %v69_v47 = vld [vmem:[%s461_s1] sm:$0x3] }
   0x7   :  { %212 = vmatpush1.bf16.msra.mxu0 %v319_v10  ;;  %v74_v50 = vrot.slane %v69_v47, %v73_v45  ;;  %v78_v51 = vrot.slane %v69_v47, %v77_v46  ;;  %v85_v52 = vld [vmem:[%s462_s2] sm:$0x3] }
   0x8   :  { %213 = vmatprep.subr.bf16.mxu0 %v338_v8  ;;  %v90_v55 = vrot.slane %v85_v52, %v73_v45  ;;  %v94_v56 = vrot.slane %v85_v52, %v77_v46  ;;  %v301_v5 = vld [vmem:[%s463_s4] ss:$0 sm:$0xff] }
   0x9   :  { %38 = vadd.xlane.f32.xlu0 %v37_v7 }
   0xb   :  { %214 = vmatpush1.bf16.msra.mxu0 %v320_v11 }
   0xc   :  { %215 = vmatprep.subr.bf16.mxu0 %v338_v8 }
   0xf   :  { %216 = vmatpush1.bf16.msra.mxu0 %v321_v12 }
  0x10   :  { %217 = vmatprep.subr.bf16.mxu0 %v338_v8 }
  0x13   :  { %218 = vmatpush1.bf16.msra.mxu0 %v322_v13 }
  0x14   :  { %219 = vmatprep.subr.bf16.mxu0 %v338_v8 }
  0x17   :  { %220 = vmatpush1.bf16.msra.mxu0 %v323_v30 }
  0x18   :  { %221 = vmatprep.subr.bf16.mxu0 %v338_v8 }
  0x1b   :  { %222 = vmatpush1.bf16.msra.mxu0 %v324_v31  ;;  %v315_v31 = vld [vmem:[%s464_s5] ss:$0 sm:$0xff] }
  0x1c   :  { %223 = vmatprep.subr.bf16.mxu0 %v338_v8 }
  0x1f   :  { %224 = vmatpush1.bf16.msra.mxu0 %v325_v32 }
  0x20   :  { %225 = vmatprep.subr.bf16.mxu0 %v338_v8 }
  0x23   :  { %226 = vmatpush1.bf16.msra.mxu0 %v326_v33 }
  0x24   :  { %227 = vmatprep.subr.bf16.mxu0 %v338_v8 }
  0x27   :  { %228 = vmatpush1.bf16.msra.mxu0 %v327_v34  ;;  %v316_v34 = vld [vmem:[%s465_s6] ss:$0 sm:$0xff] }
  0x28   :  { %229 = vmatprep.subr.bf16.mxu0 %v338_v8 }
  0x2b   :  { %230 = vmatpush1.bf16.msra.mxu0 %v328_v35 }
  0x2c   :  { %231 = vmatprep.subr.bf16.mxu0 %v338_v8 }
  0x2f   :  { %232 = vmatpush1.bf16.msra.mxu0 %v329_v36 }
  0x92   :  { %v35_v14 = vpop.xlane.xlu0 %34 }
  0x93   :  { %v41_v15 = vmul.f32 0.0052083335, %v35_v14 }
  0x95   :  { %v43_v16 = vsub.f32 %v27_v0, %v41_v15  ;;  %v44_v17 = vsub.f32 %v28_v1, %v41_v15 }
  0x96   :  { %v39_v18 = vpop.xlane.xlu0 %38 }
  0x97   :  { %v42_v19 = vmul.f32 0.0052083335, %v39_v18  ;;  %v47_v20 = vmul.f32 %v43_v16, %v43_v16  ;;  %v48_v21 = vmul.f32 %v44_v17, %v44_v17 }
  0x99   :  { %v45_v22 = vsub.f32 %v29_v3, %v42_v19  ;;  %v46_v23 = vsub.f32 %v30_v4, %v42_v19  ;;  %v51_v24 = vsel %vm31_vm0, %v48_v21, 0.0 }
  0x9a   :  { %v52_v25 = vadd.f32 %v51_v24, %v47_v20 }
  0x9b   :  { %v49_v26 = vmul.f32 %v45_v22, %v45_v22  ;;  %v50_v27 = vmul.f32 %v46_v23, %v46_v23 }
  0x9c   :  { %53 = vadd.xlane.f32.xlu1 %v52_v25 }
  0x9d   :  { %v55_v28 = vsel %vm31_vm0, %v50_v27, 0.0 }
  0x9e   :  { %v56_v29 = vadd.f32 %v55_v28, %v49_v26 }
  0xa0   :  { %57 = vadd.xlane.f32.xlu1 %v56_v29 }
 0x129   :  { %v54_v37 = vpop.xlane.xlu1 %53 }
 0x12a   :  { %v59_v38 = vmul.f32 0.0052083335, %v54_v37 }
 0x12c   :  { %v61_v39 = vadd.f32 1e-05, %v59_v38 }
 0x12d   :  { %v58_v40 = vpop.xlane.xlu1 %57 }
 0x12e   :  { %330 = vrsqrt.f32 %v61_v39  ;;  %v60_v42 = vmul.f32 0.0052083335, %v58_v40 }
 0x130   :  { %v62_v43 = vadd.f32 1e-05, %v60_v42 }
 0x132   :  { %332 = vrsqrt.f32 %v62_v43 }
 0x138   :  { %v331_v48 = vpop.eup %330 }
 0x139   :  { %v66_v49 = vmul.f32 %v331_v48, %v44_v17  ;;  %v65_v53 = vmul.f32 %v331_v48, %v43_v16 }
 0x13b   :  { %v82_v58 = vmul.f32 %v78_v51, %v66_v49  ;;  %v81_v60 = vmul.f32 %v74_v50, %v65_v53 }
 0x13c   :  { %v333_v54 = vpop.eup %332 }
 0x13d   :  { %v68_v57 = vmul.f32 %v333_v54, %v46_v23  ;;  %v67_v59 = vmul.f32 %v333_v54, %v45_v22  ;;  %v98_v63 = vadd.f32 %v94_v56, %v82_v58  ;;  %v97_v1 = vadd.f32 %v90_v55, %v81_v60 }
 0x13f   :  { %v84_v61 = vmul.f32 %v78_v51, %v68_v57  ;;  %v83_v62 = vmul.f32 %v74_v50, %v67_v59 }
 0x141   :  { %v100_v0 = vadd.f32 %v94_v56, %v84_v61  ;;  %v99_v2 = vadd.f32 %v90_v55, %v83_v62 }
 0x143   :  { %v102_v3 = vpack.c.bf16 %v100_v0, %v98_v63  ;;  %v101_v4 = vpack.c.bf16 %v99_v2, %v97_v1 }
 0x145   :  { %314 = vmatprep.mubr.msk.bf16.mxu0 %vm31_vm0, %v102_v3 }
 0x146   :  { %242 = vmatmul.mubr.bf16.vlgmr.msra.gmra.mrb[0].mxu0 %v101_v4 }
 0x219   :  { %v243_v6 = vpop.f32.mrb[0].mxu0 }
 0x21a   :  { %v244_v7 = vadd.f32 %v301_v5, %v243_v6  ;;  %v245_v8 = vpop.f32.mrb[1].mxu0 }
 0x21b   :  { %v246_v9 = vpop.f32.mrb[2].mxu0 }
 0x21c   :  { %v247_v10 = vadd.f32 %v301_v5, %v246_v9  ;;  %v248_v11 = vpop.f32.mrb[3].mxu0  ;;  %v250_v12 = vsel %vm31_vm0, %v244_v7, 0.0 }
 0x21d   :  { %251 = vadd.xlane.f32.xlu0 %v250_v12 }
 0x21e   :  { %v253_v13 = vsel %vm31_vm0, %v247_v10, 0.0 }
 0x21f   :  { %254 = vadd.xlane.f32.xlu1 %v253_v13 }
 0x2aa   :  { %v252_v14 = vpop.xlane.xlu0 %251 }
 0x2ab   :  { %v257_v15 = vmul.f32 0.015625, %v252_v14 }
 0x2ac   :  { %v255_v16 = vpop.xlane.xlu1 %254 }
 0x2ad   :  { %v259_v17 = vsub.f32 %v244_v7, %v257_v15  ;;  %v258_v18 = vmul.f32 0.015625, %v255_v16 }
 0x2af   :  { %v260_v19 = vsub.f32 %v247_v10, %v258_v18  ;;  %v261_v20 = vmul.f32 %v259_v17, %v259_v17 }
 0x2b1   :  { %v263_v21 = vsel %vm31_vm0, %v261_v20, 0.0  ;;  %v262_v22 = vmul.f32 %v260_v19, %v260_v19 }
 0x2b2   :  { %264 = vadd.xlane.f32.xlu0 %v263_v21 }
 0x2b3   :  { %v266_v23 = vsel %vm31_vm0, %v262_v22, 0.0 }
 0x2b4   :  { %267 = vadd.xlane.f32.xlu1 %v266_v23 }
 0x33f   :  { %v265_v24 = vpop.xlane.xlu0 %264 }
 0x340   :  { %v269_v25 = vmul.f32 0.015625, %v265_v24 }
 0x341   :  { %v268_v26 = vpop.xlane.xlu1 %267 }
 0x342   :  { %v271_v27 = vadd.f32 1e-05, %v269_v25  ;;  %v270_v28 = vmul.f32 0.015625, %v268_v26 }
 0x344   :  { %334 = vrsqrt.f32 %v271_v27  ;;  %v272_v29 = vadd.f32 1e-05, %v270_v28 }
 0x346   :  { %336 = vrsqrt.f32 %v272_v29 }
 0x34e   :  { %v335_v30 = vpop.eup %334 }
 0x34f   :  { %v275_v32 = vmul.f32 %v335_v30, %v259_v17 }
 0x350   :  { %v337_v33 = vpop.eup %336 }
 0x351   :  { %v284_v35 = vmul.f32 %v315_v31, %v275_v32  ;;  %v276_v36 = vmul.f32 %v337_v33, %v260_v19 }
 0x353   :  { %v293_v37 = vadd.f32 %v316_v34, %v284_v35  ;;  %v285_v38 = vmul.f32 %v315_v31, %v276_v36 }
 0x355   :  { %295 = vst.msk [vmem:[%s466_s7] sm:$0xff] %vm31_vm0, %v293_v37  ;;  %v294_v39 = vadd.f32 %v316_v34, %v285_v38 }
 0x357   :  { %296 = vst.msk [vmem:[%s466_s7 + $0x8] sm:$0xff] %vm31_vm0, %v294_v39 }

// kernel: vit_enc_forward.13
= control target key start
LH: loop header
LB: loop body
LE: loop exit
PB: predicated region body
PF: predicated region fallthrough
CT: control target
= control target key end

     0   :  { %vm22_vm0 = vcmask 523264   ;;  %v288_v36 = vmov 0   ;;  %s398_s0 = inlined_call_operand.vmem [shape: f32[32,64], index: 0, kind: input, shape index: {}]   ;;  %s399_s3 = inlined_call_operand.vmem [shape: bf16[64,256], index: 3, kind: input, shape index: {}]   ;;  %s400_s1 = inlined_call_operand.vmem [shape: f32[1,64], index: 1, kind: input, shape index: {}]   ;;  %s401_s2 = inlined_call_operand.vmem [shape: f32[1,64], index: 2, kind: input, shape index: {}]   ;;  %s402_s4 = inlined_call_operand.vmem [shape: bf16[32,256], index: 4, kind: output, shape index: {}]  }
   0x1   :  { %v18_v0 = vld [vmem:[%s398_s0] sm:$0xff]  ;;  %v20_v1 = vld [vmem:[%s398_s0 + $0x10] sm:$0xff]  ;;  %v19_v2 = vld [vmem:[%s398_s0 + $0x8] sm:$0xff]  ;;  %186 = vmatprep.mubr.bf16.mxu0 %v288_v36  ;;  %196 = vmatprep.mubr.bf16.mxu1 %v288_v36 }
   0x2   :  { %v23_v3 = vsel %vm22_vm0, %v18_v0, 0.0  ;;  %v29_v4 = vsel %vm22_vm0, %v20_v1, 0.0  ;;  %v21_v5 = vld [vmem:[%s398_s0 + $0x18] sm:$0xff]  ;;  %v26_v6 = vsel %vm22_vm0, %v19_v2, 0.0  ;;  %v268_v28 = vld [vmem:[%s399_s3 + $0x4] ss:$8 sps:$4 sm:$0xff]  }
   0x3   :  { %24 = vadd.xlane.f32.xlu0 %v23_v3  ;;  %30 = vadd.xlane.f32.xlu1 %v29_v4  ;;  %v32_v7 = vsel %vm22_vm0, %v21_v5, 0.0  ;;  %v270_v29 = vld [vmem:[%s399_s3] ss:$8 sps:$4 sm:$0xff]   ;;  %v271_v30 = vld [vmem:[%s399_s3 + $0x14] ss:$8 sps:$4 sm:$0xff]  }
   0x4   :  { %154 = vmatprep.subr.bf16.mxu0 %v268_v28  ;;  %259 = vmatprep.subr.bf16.mxu1 %v268_v28  ;;  %v273_v31 = vld [vmem:[%s399_s3 + $0x10] ss:$8 sps:$4 sm:$0xff]   ;;  %v274_v32 = vld [vmem:[%s399_s3 + $0x24] ss:$8 sps:$4 sm:$0xff]   ;;  %v276_v33 = vld [vmem:[%s399_s3 + $0x20] ss:$8 sps:$4 sm:$0xff]  }
   0x5   :  { %155 = vmatpush1.bf16.msra.mxu0 %v270_v29  ;;  %263 = vmatpush1.bf16.msra.mxu1 %v270_v29  ;;  %v277_v34 = vld [vmem:[%s399_s3 + $0x34] ss:$8 sps:$4 sm:$0xff]   ;;  %v279_v35 = vld [vmem:[%s399_s3 + $0x30] ss:$8 sps:$4 sm:$0xff]   ;;  %v239_v51 = vld [vmem:[%s400_s1] ss:$0 sm:$0xff] }
   0x6   :  { %156 = vmatprep.subr.bf16.mxu0 %v271_v30  ;;  %260 = vmatprep.subr.bf16.mxu1 %v271_v30  ;;  %v240_v57 = vld [vmem:[%s401_s2] ss:$0 sm:$0xff] }
   0x7   :  { %27 = vadd.xlane.f32.xlu0 %v26_v6  ;;  %33 = vadd.xlane.f32.xlu1 %v32_v7 }
   0x9   :  { %157 = vmatpush1.bf16.msra.mxu0 %v273_v31  ;;  %264 = vmatpush1.bf16.msra.mxu1 %v273_v31 }
   0xa   :  { %158 = vmatprep.subr.bf16.mxu0 %v274_v32  ;;  %261 = vmatprep.subr.bf16.mxu1 %v274_v32 }
   0xd   :  { %159 = vmatpush1.bf16.msra.mxu0 %v276_v33  ;;  %265 = vmatpush1.bf16.msra.mxu1 %v276_v33 }
   0xe   :  { %160 = vmatprep.subr.bf16.mxu0 %v277_v34  ;;  %262 = vmatprep.subr.bf16.mxu1 %v277_v34 }
  0x11   :  { %161 = vmatpush1.bf16.msra.mxu0 %v279_v35  ;;  %266 = vmatpush1.bf16.msra.mxu1 %v279_v35 }
  0x90   :  { %v25_v8 = vpop.xlane.xlu0 %24  ;;  %v31_v9 = vpop.xlane.xlu1 %30 }
  0x91   :  { %v36_v10 = vmul.f32 0.015625, %v25_v8  ;;  %v38_v11 = vmul.f32 0.015625, %v31_v9 }
  0x93   :  { %v330_v12 = vsub.f32 %v18_v0, %v36_v10  ;;  %v332_v13 = vsub.f32 %v20_v1, %v38_v11 }
  0x94   :  { %v28_v14 = vpop.xlane.xlu0 %27  ;;  %v34_v15 = vpop.xlane.xlu1 %33 }
  0x95   :  { %v37_v16 = vmul.f32 0.015625, %v28_v14  ;;  %v39_v17 = vmul.f32 0.015625, %v34_v15  ;;  %v44_v18 = vmul.f32 %v330_v12, %v330_v12  ;;  %v46_v19 = vmul.f32 %v332_v13, %v332_v13 }
  0x97   :  { %v338_v20 = vsub.f32 %v19_v2, %v37_v16  ;;  %v340_v21 = vsub.f32 %v21_v5, %v39_v17  ;;  %v48_v22 = vsel %vm22_vm0, %v44_v18, 0.0  ;;  %v54_v23 = vsel %vm22_vm0, %v46_v19, 0.0 }
  0x98   :  { %49 = vadd.xlane.f32.xlu0 %v48_v22 }
  0x99   :  { %v45_v24 = vmul.f32 %v338_v20, %v338_v20  ;;  %v47_v25 = vmul.f32 %v340_v21, %v340_v21 }
  0x9b   :  { %v51_v26 = vsel %vm22_vm0, %v45_v24, 0.0  ;;  %v57_v27 = vsel %vm22_vm0, %v47_v25, 0.0 }
  0x9c   :  { %55 = vadd.xlane.f32.xlu0 %v54_v23  ;;  %52 = vadd.xlane.f32.xlu1 %v51_v26 }
  0xa0   :  { %58 = vadd.xlane.f32.xlu1 %v57_v27 }
 0x125   :  { %v50_v37 = vpop.xlane.xlu0 %49 }
 0x126   :  { %v60_v38 = vmul.f32 0.015625, %v50_v37 }
 0x128   :  { %v64_v39 = vadd.f32 1e-05, %v60_v38 }
 0x129   :  { %v53_v40 = vpop.xlane.xlu1 %52  ;;  %v56_v41 = vpop.xlane.xlu0 %55 }
 0x12a   :  { %280 = vrsqrt.f32 %v64_v39  ;;  %v61_v42 = vmul.f32 0.015625, %v53_v40  ;;  %v62_v43 = vmul.f32 0.015625, %v56_v41 }
 0x12c   :  { %v65_v44 = vadd.f32 1e-05, %v61_v42  ;;  %v66_v45 = vadd.f32 1e-05, %v62_v43 }
 0x12d   :  { %v59_v46 = vpop.xlane.xlu1 %58 }
 0x12e   :  { %282 = vrsqrt.f32 %v65_v44  ;;  %v63_v47 = vmul.f32 0.015625, %v59_v46 }
 0x12f   :  { %284 = vrsqrt.f32 %v66_v45 }
 0x130   :  { %v67_v48 = vadd.f32 1e-05, %v63_v47 }
 0x132   :  { %286 = vrsqrt.f32 %v67_v48 }
 0x134   :  { %v281_v49 = vpop.eup %280 }
 0x135   :  { %v72_v50 = vmul.f32 %v281_v49, %v330_v12 }
 0x137   :  { %v83_v55 = vmul.f32 %v239_v51, %v72_v50 }
 0x138   :  { %v283_v52 = vpop.eup %282 }
 0x139   :  { %v285_v53 = vpop.eup %284  ;;  %v73_v54 = vmul.f32 %v283_v52, %v338_v20  ;;  %v94_v61 = vadd.f32 %v240_v57, %v83_v55 }
 0x13a   :  { %v74_v56 = vmul.f32 %v285_v53, %v332_v13 }
 0x13b   :  { %v84_v58 = vmul.f32 %v239_v51, %v73_v54 }
 0x13c   :  { %v287_v59 = vpop.eup %286  ;;  %v85_v63 = vmul.f32 %v239_v51, %v74_v56 }
 0x13d   :  { %v75_v60 = vmul.f32 %v287_v59, %v340_v21  ;;  %v95_v62 = vadd.f32 %v240_v57, %v84_v58 }
 0x13e   :  { %v96_v2 = vadd.f32 %v240_v57, %v85_v63 }
 0x13f   :  { %v98_v0 = vpack.c.bf16 %v95_v62, %v94_v61  ;;  %v86_v1 = vmul.f32 %v239_v51, %v75_v60 }
 0x141   :  { %249 = vmatmul.mubr.msk.bf16.vlgmr.msra.gmra.mrb[0].mxu0 %vm22_vm0, %v98_v0  ;;  %v97_v3 = vadd.f32 %v240_v57, %v86_v1 }
 0x143   :  { %v99_v4 = vpack.c.bf16 %v97_v3, %v96_v2 }
 0x145   :  { %250 = vmatmul.mubr.msk.bf16.vlgmr.msra.gmra.mrb[0].mxu1 %vm22_vm0, %v99_v4 }
 0x214   :  { %v188_v5 = vpop.f32.mrb[0].mxu0 }
 0x215   :  { %v190_v6 = vpop.f32.mrb[1].mxu0 }
 0x216   :  { %v255_v7 = vpack.c.bf16 %v190_v6, %v188_v5  ;;  %v192_v8 = vpop.f32.mrb[2].mxu0 }
 0x217   :  { %v194_v9 = vpop.f32.mrb[3].mxu0 }
 0x218   :  { %231 = vst [vmem:[%s402_s4] sm:$0xff] %v255_v7  ;;  %v256_v10 = vpack.c.bf16 %v194_v9, %v192_v8  ;;  %v198_v11 = vpop.f32.mrb[0].mxu1 }
 0x219   :  { %v200_v12 = vpop.f32.mrb[1].mxu1 }
 0x21a   :  { %232 = vst [vmem:[%s402_s4 + $0x8] sm:$0xff] %v256_v10  ;;  %v257_v13 = vpack.c.bf16 %v200_v12, %v198_v11  ;;  %v202_v14 = vpop.f32.mrb[2].mxu1 }
 0x21b   :  { %v204_v15 = vpop.f32.mrb[3].mxu1 }
 0x21c   :  { %233 = vst [vmem:[%s402_s4 + $0x10] sm:$0xff] %v257_v13  ;;  %v258_v16 = vpack.c.bf16 %v204_v15, %v202_v14 }
 0x21e   :  { %234 = vst [vmem:[%s402_s4 + $0x18] sm:$0xff] %v258_v16 }

// kernel: vit_enc_forward.14
= control target key start
LH: loop header
LB: loop body
LE: loop exit
PB: predicated region body
PF: predicated region fallthrough
CT: control target
= control target key end

     0   :  { %s787_s12 = smov 0   ;;  %s789_s13 = smov 0   ;;  %s845_s0 = inlined_call_operand.vmem [shape: bf16[8,16,128], index: 0, kind: input, shape index: {}]   ;;  %s846_s1 = inlined_call_operand.vmem [shape: bf16[8,16,128], index: 1, kind: input, shape index: {}]   ;;  %s847_s2 = inlined_call_operand.vmem [shape: bf16[8,16,128], index: 2, kind: input, shape index: {}]   ;;  %s848_s3 = inlined_call_operand.vmem [shape: bf16[8,16,128], index: 3, kind: output, shape index: {}]  }
   0x1   :  { %s791_s14 = smov 0  }
   0x2 LB: > { %s32_s15 = sadd.s32 1, %s757_s13  ;;  %p650_p0 = scmp.ge.s32.totalorder %s761_s14, 1  ;;  %s761_s14 = sphi %s791_s14, %s13_s14   ;;  %s757_s13 = sphi %s789_s13, %s850_s13   ;;  %s753_s12 = sphi %s787_s12, %s849_s12  }
   0x3   : > { %p34_p1 = scmp.ge.s32.totalorder %s32_s15, 8  ;;  %p199_p2 = scmp.lt.s32.totalorder %s761_s14, 9 }
   0x5   : > { %s852_s15 = smov (%p34_p1, %s32_s15), 0  ;;  %p200_p3 = pnand %p650_p0, %p199_p2 }
   0x6   : > { %p250_p4 = scmp.lt.s32.totalorder (!%p200_p3), %s753_s12, 7  ;;  %v763_v0 = vmov (!%p200_p3), 0.0   ;;  %vm764_vm0 = vmmov (!%p200_p3), 0   ;;  %vm294_vm1 = vcmask (!%p200_p3), 7168   ;;  %v765_v3 = vmov (!%p200_p3), -1e+30  }
   0x7   : > { %203 = sbr.rel (%p200_p3) target bundleno = 829 (0x33d), region = 32  ;;  %682 = vmatprep.subr.bf16.mxu0 (!%p200_p3), %v763_v0  ;;  %684 = vmatprep.mubr.msk.bf16.mxu0 (!%p200_p3), %vm764_vm0, %v763_v0  ;;  %295 = vst.msk [vmem:[#allocation2] sm:$0xff] (!%p200_p3), %vm294_vm1, %v765_v3  ;;  %296 = vst.msk [vmem:[#allocation2 + $0x8] sm:$0xff] (!%p200_p3), %vm294_vm1, %v765_v3  ;;  %v363_v4 = vlaneseq (!%p200_p3)  ;;  %vm372_vm3 = vcmask (!%p200_p3), 130048   ;;  %v766_v16 = vmov (!%p200_p3), 0  }
   0x8   : > { %688 = vmatprep.subr.bf16.mxu1 (!%p200_p3), %v763_v0  ;;  %690 = vmatprep.mubr.msk.bf16.mxu1 (!%p200_p3), %vm764_vm0, %v763_v0  ;;  %297 = vst.msk [vmem:[#allocation3] sm:$0xff] (!%p200_p3), %vm294_vm1, %v763_v0  ;;  %298 = vst.msk [vmem:[#allocation3 + $0x8] sm:$0xff] (!%p200_p3), %vm294_vm1, %v763_v0 }
   0x9   : > { %v364_v5 = vand.u32 (!%p200_p3), 127, %v363_v4  ;;  %722 = vset.pattern.permute.xlu1 (!%p200_p3), %v766_v16  ;;  %723 = vset.pattern.permute.xlu0 (!%p200_p3), %v766_v16 }
   0xb   : > { %vm367_vm2 = vcmp.lt.s32.totalorder (!%p200_p3), %v364_v5, 9 }
   0xe   : > { %s854_s12 = smov (!%p250_p4, %s753_s12), 7  ;;  %v370_v17 = vld [vmem:[#allocation2] sm:$0xff]  ;;  %v371_v20 = vld [vmem:[#allocation2 + $0x8] sm:$0xff] }
   0xf   : > { %s805_s16 = sshll.u32 %s854_s12, 3  ;;  %v403_v41 = vld [vmem:[#allocation3] sm:$0xff]  ;;  %v404_v44 = vld [vmem:[#allocation3 + $0x8] sm:$0xff] }
  0x10   : > { %s267_s19 = scalar_lea.vmem %s846_s1, %s805_s16  ;;  %s257_s22 = scalar_lea.vmem %s845_s0, %s805_s16 }
  0x11   : > { %v724_v1 = vld [vmem:[%s267_s19] sm:$0xff]   ;;  %s277_s25 = scalar_lea.vmem %s847_s2, %s805_s16  ;;  %s287_s28 = scalar_lea.vmem %s848_s3, %s805_s16 }
  0x12   : > { %683 = vmatpush3.bf16.xpose.msra.mxu0 %v724_v1  ;;  %v725_v2 = vld [vmem:[%s257_s22] sm:$0xff]  }
  0x13   : > { %v726_v25 = vld [vmem:[%s277_s25] sm:$0xff]  }
  0x14   : > { %689 = vmatpush3.bf16.msra.mxu1 %v726_v25 }
  0x19   : > { %685 = vmatmul.mubr.bf16.vlgmr.msra.gmra.mrb[0].mxu0 %v725_v2 }
  0xec   : > { %v353_v6 = vpop.f32.mrb[0].mxu0 }
  0xed   : > { %v360_v7 = vmul.f32 0.25, %v353_v6  ;;  %v686_v8 = vpop.f32.mrb[1].mxu0 }
  0xee   : > { %v356_v9 = vpop.f32.mrb[2].mxu0 }
  0xef   : > { %v361_v10 = vmul.f32 0.25, %v356_v9  ;;  %v687_v11 = vpop.f32.mrb[3].mxu0  ;;  %v368_v12 = vsel %vm367_vm2, %v360_v7, -1e+30 }
  0xf0   : > { %v373_v13 = vsel %vm372_vm3, %v368_v12, -inf }
  0xf1   : > { %374 = vmax.xlane.f32.xlu0 %v373_v13  ;;  %v369_v14 = vsel %vm367_vm2, %v361_v10, -1e+30 }
  0xf2   : > { %v376_v15 = vsel %vm372_vm3, %v369_v14, -inf }
  0xf5   : > { %377 = vmax.xlane.f32.xlu0 %v376_v15 }
 0x17e   : > { %v375_v18 = vpop.xlane.xlu0 %374 }
 0x17f   : > { %v379_v19 = vmax.f32 %v370_v17, %v375_v18 }
 0x181   : > { %v381_v21 = vsub.f32 %v370_v17, %v379_v19  ;;  %487 = vst.msk [vmem:[#allocation2] sm:$0xff] %vm294_vm1, %v379_v19  ;;  %389 = vperm.xlu1 %722, %v379_v19  }
 0x182   : > { %v378_v22 = vpop.xlane.xlu0 %377 }
 0x183   : > { %v380_v23 = vmax.f32 %v371_v20, %v378_v22  ;;  %v383_v38 = vmul.f32 1.442695, %v381_v21 }
 0x185   : > { %v382_v24 = vsub.f32 %v371_v20, %v380_v23  ;;  %488 = vst.msk [vmem:[#allocation2 + $0x8] sm:$0xff] %vm294_vm1, %v380_v23  ;;  %394 = vperm.xlu1 %722, %v380_v23  }
 0x187   : > { %v385_v37 = vmul.f32 1.442695, %v382_v24 }
 0x200   : > { %v390_v26 = vpop.permute.xlu1 %389 }
 0x201   : > { %v397_v27 = vsub.f32 %v368_v12, %v390_v26 }
 0x203   : > { %v399_v28 = vmul.f32 1.442695, %v397_v27 }
 0x204   : > { %v395_v29 = vpop.permute.xlu1 %394 }
 0x205   : > { %727 = vpow2.f32 %v399_v28  ;;  %v398_v30 = vsub.f32 %v369_v14, %v395_v29 }
 0x207   : > { %v401_v31 = vmul.f32 1.442695, %v398_v30 }
 0x209   : > { %729 = vpow2.f32 %v401_v31 }
 0x20a   : > { %731 = vpow2.f32 %v385_v37 }
 0x20b   : > { %733 = vpow2.f32 %v383_v38 }
 0x20f   : > { %v728_v32 = vpop.eup %727 }
 0x210   : > { %v407_v33 = vsel %vm372_vm3, %v728_v32, 0.0 }
 0x211   : > { %408 = vadd.xlane.f32.xlu0 %v407_v33 }
 0x213   : > { %v730_v34 = vpop.eup %729 }
 0x214   : > { %v410_v35 = vsel %vm372_vm3, %v730_v34, 0.0  ;;  %v432_v36 = vpack.c.bf16 %v730_v34, %v728_v32  ;;  %v732_v39 = vpop.eup %731 }
 0x215   : > { %411 = vadd.xlane.f32.xlu1 %v410_v35  ;;  %v734_v40 = vpop.eup %733  ;;  %v406_v46 = vmul.f32 %v732_v39, %v404_v44 }
 0x216   : > { %691 = vmatmul.mubr.msk.bf16.vlgmr.msra.gmra.mrb[0].mxu1 %vm372_vm3, %v432_v36  ;;  %v405_v42 = vmul.f32 %v734_v40, %v403_v41 }
 0x226   : > { %427 = vperm.xlu1 %722, %v732_v39  }
 0x227   : > { %422 = vperm.xlu0 %723, %v734_v40  }
 0x29e   : > { %v409_v43 = vpop.xlane.xlu0 %408 }
 0x29f   : > { %v413_v45 = vadd.f32 %v409_v43, %v405_v42 }
 0x2a1   : > { %416 = vst.msk [vmem:[#allocation3] sm:$0xff] %vm294_vm1, %v413_v45 }
 0x2a2   : > { %v412_v47 = vpop.xlane.xlu1 %411 }
 0x2a3   : > { %v414_v48 = vadd.f32 %v412_v47, %v406_v46 }
 0x2a5   : > { %417 = vst.msk [vmem:[#allocation3 + $0x8] sm:$0xff] %vm294_vm1, %v414_v48 }
 0x2a6   : > { %v423_v57 = vpop.permute.xlu0 %422  ;;  %v428_v58 = vpop.permute.xlu1 %427 }
 0x2a7   : > { %v431_v60 = vmul.f32 0.0, %v428_v58  ;;  %v430_v61 = vmul.f32 0.0, %v423_v57 }
 0x2a8   : > { %v494_v49 = vld [vmem:[#allocation3] sm:$0xff] }
 0x2a9   : > { %735 = vrcp.f32 %v494_v49 }
 0x2ac   : > { %v495_v50 = vld [vmem:[#allocation3 + $0x8] sm:$0xff] }
 0x2ad   : > { %737 = vrcp.f32 %v495_v50 }
 0x2b3   : > { %v736_v51 = vpop.eup %735 }
 0x2b4   : > { %500 = vperm.xlu0 %723, %v736_v51  }
 0x2b7   : > { %v738_v52 = vpop.eup %737 }
 0x2b8   : > { %505 = vperm.xlu0 %723, %v738_v52  }
 0x2e9   : > { %v476_v53 = vpop.f32.mrb[0].mxu1 }
 0x2ea   : > { %v692_v54 = vpop.f32.mrb[1].mxu1  ;;  %v483_v62 = vadd.f32 %v476_v53, %v430_v61 }
 0x2eb   : > { %v479_v55 = vpop.f32.mrb[2].mxu1 }
 0x2ec   : > { %v693_v56 = vpop.f32.mrb[3].mxu1  ;;  %v484_v63 = vadd.f32 %v479_v55, %v431_v60 }
 0x333   : > { %v501_v59 = vpop.permute.xlu0 %500 }
 0x334   : > { %v508_v1 = vmul.f32 %v501_v59, %v483_v62 }
 0x337   : > { %v506_v0 = vpop.permute.xlu0 %505 }
 0x338   : > { %v509_v2 = vmul.f32 %v506_v0, %v484_v63 }
 0x33a   : > { %v676_v3 = vpack.c.bf16 %v509_v2, %v508_v1 }
 0x33c   : > { %677 = vst [vmem:[%s287_s28] sm:$0xff] %v676_v3  }
 0x33d PF: > { %s13_s14 = sadd.s32 1, %s761_s14   ;;  %s849_s12 = smov %s757_s13 }
 0x33e   : > { %p10_p5 = scmp.ge.s32.totalorder %s13_s14, 10   ;;  %s850_s13 = smov %s852_s15 }
 0x340   :  { %12 = sbr.rel (!%p10_p5) target bundleno = 2 (0x2), region = 76 }

// kernel: vit_enc_forward.15
= control target key start
LH: loop header
LB: loop body
LE: loop exit
PB: predicated region body
PF: predicated region fallthrough
CT: control target
= control target key end

     0   :  { %vm71_vm0 = vcmask 523264   ;;  %s246_s1 = inlined_call_operand.vmem [shape: bf16[64,128], index: 1, kind: input, shape index: {}]   ;;  %s247_s0 = inlined_call_operand.vmem [shape: bf16[32,64], index: 0, kind: input, shape index: {}]   ;;  %s248_s2 = inlined_call_operand.vmem [shape: f32[1,128], index: 2, kind: input, shape index: {}]   ;;  %s249_s3 = inlined_call_operand.vmem [shape: f32[32,128], index: 3, kind: input, shape index: {}]   ;;  %s250_s4 = inlined_call_operand.vmem [shape: f32[32,128], index: 4, kind: output, shape index: {}]  }
   0x1   :  { %v170_v0 = vld [vmem:[%s246_s1] sm:$0xff]   ;;  %v171_v1 = vld [vmem:[%s246_s1 + $0x8] sm:$0xff]   ;;  %v172_v2 = vld [vmem:[%s246_s1 + $0x10] sm:$0xff]  }
   0x2   :  { %158 = vmatprep.subr.bf16.mxu0 %v170_v0  ;;  %v174_v3 = vld [vmem:[%s247_s0] sm:$0xff]   ;;  %v173_v4 = vld [vmem:[%s246_s1 + $0x18] sm:$0xff]   ;;  %v175_v5 = vld [vmem:[%s247_s0 + $0x8] sm:$0xff]  }
   0x3   :  { %159 = vmatpush3.bf16.msra.mxu0 %v170_v0  ;;  %166 = vmatprep.mubr.msk.bf16.mxu0 %vm71_vm0, %v174_v3  ;;  %v143_v6 = vld [vmem:[%s248_s2] ss:$0 sm:$0xff]  ;;  %v129_v8 = vld [vmem:[%s249_s3 + $0x10] sm:$0xff]  ;;  %v130_v14 = vld [vmem:[%s249_s3 + $0x18] sm:$0xff] }
   0x4   :  { %160 = vmatprep.subr.bf16.mxu0 %v171_v1  ;;  %v127_v11 = vld [vmem:[%s249_s3] sm:$0xff]  ;;  %v128_v18 = vld [vmem:[%s249_s3 + $0x8] sm:$0xff] }
   0x7   :  { %161 = vmatpush3.bf16.msra.mxu0 %v171_v1 }
   0x8   :  { %162 = vmatprep.subr.bf16.mxu0 %v172_v2 }
   0xb   :  { %163 = vmatpush3.bf16.msra.mxu0 %v172_v2 }
   0xc   :  { %164 = vmatprep.subr.bf16.mxu0 %v173_v4 }
   0xf   :  { %165 = vmatpush3.bf16.msra.mxu0 %v173_v4 }
  0x12   :  { %167 = vmatmul.mubr.msk.bf16.vlgmr.msra.gmra.mrb[0].mxu0 %vm71_vm0, %v175_v5 }
  0xe5   :  { %v168_v7 = vpop.f32.mrb[0].mxu0 }
  0xe6   :  { %v121_v9 = vadd.f32 %v168_v7, %v143_v6  ;;  %v112_v10 = vpop.f32.mrb[1].mxu0 }
  0xe7   :  { %v113_v12 = vadd.f32 %v143_v6, %v112_v10  ;;  %v169_v13 = vpop.f32.mrb[2].mxu0 }
  0xe8   :  { %v133_v15 = vadd.f32 %v129_v8, %v121_v9  ;;  %v124_v16 = vadd.f32 %v169_v13, %v143_v6  ;;  %v115_v17 = vpop.f32.mrb[3].mxu0 }
  0xe9   :  { %v131_v19 = vadd.f32 %v127_v11, %v113_v12  ;;  %v116_v20 = vadd.f32 %v143_v6, %v115_v17 }
  0xea   :  { %137 = vst [vmem:[%s250_s4 + $0x10] sm:$0xff] %v133_v15  ;;  %v134_v21 = vadd.f32 %v130_v14, %v124_v16 }
  0xeb   :  { %135 = vst [vmem:[%s250_s4] sm:$0xff] %v131_v19  ;;  %v132_v22 = vadd.f32 %v128_v18, %v116_v20 }
  0xec   :  { %138 = vst [vmem:[%s250_s4 + $0x18] sm:$0xff] %v134_v21 }
  0xed   :  { %136 = vst [vmem:[%s250_s4 + $0x8] sm:$0xff] %v132_v22 }

// kernel: vit_enc_forward.16
= control target key start
LH: loop header
LB: loop body
LE: loop exit
PB: predicated region body
PF: predicated region fallthrough
CT: control target
= control target key end

     0   :  { %vm25_vm0 = vcmask 523264   ;;  %s402_s0 = inlined_call_operand.vmem [shape: f32[32,64], index: 0, kind: input, shape index: {}]   ;;  %s403_s3 = inlined_call_operand.vmem [shape: bf16[64,128], index: 3, kind: input, shape index: {}]   ;;  %s404_s1 = inlined_call_operand.vmem [shape: f32[1,64], index: 1, kind: input, shape index: {}]   ;;  %s405_s2 = inlined_call_operand.vmem [shape: f32[1,64], index: 2, kind: input, shape index: {}]   ;;  %s406_s4 = inlined_call_operand.vmem [shape: f32[1,128], index: 4, kind: input, shape index: {}]   ;;  %s407_s5 = inlined_call_operand.vmem [shape: bf16[32,128], index: 5, kind: output, shape index: {}]  }
   0x1   :  { %v21_v0 = vld [vmem:[%s402_s0] sm:$0xff]  ;;  %v23_v1 = vld [vmem:[%s402_s0 + $0x10] sm:$0xff]  ;;  %v22_v2 = vld [vmem:[%s402_s0 + $0x8] sm:$0xff] }
   0x2   :  { %v26_v3 = vsel %vm25_vm0, %v21_v0, 0.0  ;;  %v32_v4 = vsel %vm25_vm0, %v23_v1, 0.0  ;;  %v24_v5 = vld [vmem:[%s402_s0 + $0x18] sm:$0xff]  ;;  %v29_v6 = vsel %vm25_vm0, %v22_v2, 0.0  ;;  %v303_v28 = vld [vmem:[%s403_s3] sm:$0xff]   ;;  %v304_v29 = vld [vmem:[%s403_s3 + $0x8] sm:$0xff]  }
   0x3   :  { %27 = vadd.xlane.f32.xlu0 %v26_v3  ;;  %33 = vadd.xlane.f32.xlu1 %v32_v4  ;;  %v35_v7 = vsel %vm25_vm0, %v24_v5, 0.0  ;;  %v305_v30 = vld [vmem:[%s403_s3 + $0x10] sm:$0xff]   ;;  %v306_v31 = vld [vmem:[%s403_s3 + $0x18] sm:$0xff]   ;;  %v257_v46 = vld [vmem:[%s404_s1] ss:$0 sm:$0xff] }
   0x4   :  { %291 = vmatprep.subr.bf16.mxu0 %v303_v28  ;;  %v258_v52 = vld [vmem:[%s405_s2] ss:$0 sm:$0xff] }
   0x5   :  { %292 = vmatpush3.bf16.msra.mxu0 %v303_v28 }
   0x6   :  { %293 = vmatprep.subr.bf16.mxu0 %v304_v29 }
   0x7   :  { %30 = vadd.xlane.f32.xlu0 %v29_v6  ;;  %36 = vadd.xlane.f32.xlu1 %v35_v7 }
   0x9   :  { %294 = vmatpush3.bf16.msra.mxu0 %v304_v29 }
   0xa   :  { %295 = vmatprep.subr.bf16.mxu0 %v305_v30 }
   0xd   :  { %296 = vmatpush3.bf16.msra.mxu0 %v305_v30 }
   0xe   :  { %297 = vmatprep.subr.bf16.mxu0 %v306_v31 }
  0x11   :  { %298 = vmatpush3.bf16.msra.mxu0 %v306_v31 }
  0x90   :  { %v28_v8 = vpop.xlane.xlu0 %27  ;;  %v34_v9 = vpop.xlane.xlu1 %33 }
  0x91   :  { %v39_v10 = vmul.f32 0.015625, %v28_v8  ;;  %v41_v11 = vmul.f32 0.015625, %v34_v9 }
  0x93   :  { %v43_v12 = vsub.f32 %v21_v0, %v39_v10  ;;  %v45_v13 = vsub.f32 %v23_v1, %v41_v11  ;;  %v259_v0 = vld [vmem:[%s406_s4] ss:$0 sm:$0xff] }
  0x94   :  { %v31_v14 = vpop.xlane.xlu0 %30  ;;  %v37_v15 = vpop.xlane.xlu1 %36 }
  0x95   :  { %v40_v16 = vmul.f32 0.015625, %v31_v14  ;;  %v42_v17 = vmul.f32 0.015625, %v37_v15  ;;  %v47_v18 = vmul.f32 %v43_v12, %v43_v12  ;;  %v49_v19 = vmul.f32 %v45_v13, %v45_v13 }
  0x97   :  { %v44_v20 = vsub.f32 %v22_v2, %v40_v16  ;;  %v46_v21 = vsub.f32 %v24_v5, %v42_v17  ;;  %v51_v22 = vsel %vm25_vm0, %v47_v18, 0.0  ;;  %v57_v23 = vsel %vm25_vm0, %v49_v19, 0.0 }
  0x98   :  { %52 = vadd.xlane.f32.xlu0 %v51_v22 }
  0x99   :  { %v48_v24 = vmul.f32 %v44_v20, %v44_v20  ;;  %v50_v25 = vmul.f32 %v46_v21, %v46_v21 }
  0x9b   :  { %v54_v26 = vsel %vm25_vm0, %v48_v24, 0.0  ;;  %v60_v27 = vsel %vm25_vm0, %v50_v25, 0.0 }
  0x9c   :  { %58 = vadd.xlane.f32.xlu0 %v57_v23  ;;  %55 = vadd.xlane.f32.xlu1 %v54_v26 }
  0xa0   :  { %61 = vadd.xlane.f32.xlu1 %v60_v27 }
 0x125   :  { %v53_v32 = vpop.xlane.xlu0 %52 }
 0x126   :  { %v63_v33 = vmul.f32 0.015625, %v53_v32 }
 0x128   :  { %v67_v34 = vadd.f32 1e-05, %v63_v33 }
 0x129   :  { %v56_v35 = vpop.xlane.xlu1 %55  ;;  %v59_v36 = vpop.xlane.xlu0 %58 }
 0x12a   :  { %307 = vrsqrt.f32 %v67_v34  ;;  %v64_v37 = vmul.f32 0.015625, %v56_v35  ;;  %v65_v38 = vmul.f32 0.015625, %v59_v36 }
 0x12c   :  { %v68_v39 = vadd.f32 1e-05, %v64_v37  ;;  %v69_v40 = vadd.f32 1e-05, %v65_v38 }
 0x12d   :  { %v62_v41 = vpop.xlane.xlu1 %61 }
 0x12e   :  { %309 = vrsqrt.f32 %v68_v39  ;;  %v66_v42 = vmul.f32 0.015625, %v62_v41 }
 0x12f   :  { %311 = vrsqrt.f32 %v69_v40 }
 0x130   :  { %v70_v43 = vadd.f32 1e-05, %v66_v42 }
 0x132   :  { %313 = vrsqrt.f32 %v70_v43 }
 0x134   :  { %v308_v44 = vpop.eup %307 }
 0x135   :  { %v75_v45 = vmul.f32 %v308_v44, %v43_v12 }
 0x137   :  { %v86_v50 = vmul.f32 %v257_v46, %v75_v45 }
 0x138   :  { %v310_v47 = vpop.eup %309 }
 0x139   :  { %v312_v48 = vpop.eup %311  ;;  %v76_v49 = vmul.f32 %v310_v47, %v44_v20  ;;  %v97_v56 = vadd.f32 %v258_v52, %v86_v50 }
 0x13a   :  { %v77_v51 = vmul.f32 %v312_v48, %v45_v13 }
 0x13b   :  { %v87_v53 = vmul.f32 %v257_v46, %v76_v49 }
 0x13c   :  { %v314_v54 = vpop.eup %313  ;;  %v88_v58 = vmul.f32 %v257_v46, %v77_v51 }
 0x13d   :  { %v78_v55 = vmul.f32 %v314_v54, %v46_v21  ;;  %v98_v57 = vadd.f32 %v258_v52, %v87_v53 }
 0x13e   :  { %v99_v61 = vadd.f32 %v258_v52, %v88_v58 }
 0x13f   :  { %v101_v59 = vpack.c.bf16 %v98_v57, %v97_v56  ;;  %v89_v60 = vmul.f32 %v257_v46, %v78_v55 }
 0x141   :  { %299 = vmatprep.mubr.msk.bf16.mxu0 %vm25_vm0, %v101_v59  ;;  %v100_v62 = vadd.f32 %v258_v52, %v89_v60 }
 0x143   :  { %v102_v63 = vpack.c.bf16 %v100_v62, %v99_v61 }
 0x145   :  { %300 = vmatmul.mubr.msk.bf16.vlgmr.msra.gmra.mrb[0].mxu0 %vm25_vm0, %v102_v63 }
 0x218   :  { %v301_v1 = vpop.f32.mrb[0].mxu0 }
 0x219   :  { %v191_v2 = vadd.f32 %v301_v1, %v259_v0  ;;  %v182_v3 = vpop.f32.mrb[1].mxu0 }
 0x21a   :  { %v183_v4 = vadd.f32 %v259_v0, %v182_v3  ;;  %v302_v5 = vpop.f32.mrb[2].mxu0 }
 0x21b   :  { %v203_v6 = vmul.f32 0.044715, %v191_v2  ;;  %v194_v7 = vadd.f32 %v302_v5, %v259_v0  ;;  %v185_v8 = vpop.f32.mrb[3].mxu0  ;;  %v199_v35 = vmul.f32 0.5, %v191_v2 }
 0x21c   :  { %v201_v9 = vmul.f32 0.044715, %v183_v4  ;;  %v186_v10 = vadd.f32 %v259_v0, %v185_v8  ;;  %v197_v38 = vmul.f32 0.5, %v183_v4 }
 0x21d   :  { %v207_v11 = vmul.f32 %v203_v6, %v191_v2  ;;  %v204_v12 = vmul.f32 0.044715, %v194_v7  ;;  %v200_v36 = vmul.f32 0.5, %v194_v7 }
 0x21e   :  { %v205_v13 = vmul.f32 %v201_v9, %v183_v4  ;;  %v202_v14 = vmul.f32 0.044715, %v186_v10  ;;  %v198_v39 = vmul.f32 0.5, %v186_v10 }
 0x21f   :  { %v211_v15 = vmul.f32 %v207_v11, %v191_v2  ;;  %v208_v16 = vmul.f32 %v204_v12, %v194_v7 }
 0x220   :  { %v209_v17 = vmul.f32 %v205_v13, %v183_v4  ;;  %v206_v18 = vmul.f32 %v202_v14, %v186_v10 }
 0x221   :  { %v215_v19 = vadd.f32 %v211_v15, %v191_v2  ;;  %v212_v20 = vmul.f32 %v208_v16, %v194_v7 }
 0x222   :  { %v213_v21 = vadd.f32 %v209_v17, %v183_v4  ;;  %v210_v22 = vmul.f32 %v206_v18, %v186_v10 }
 0x223   :  { %v219_v23 = vmul.f32 0.7978846, %v215_v19  ;;  %v216_v24 = vadd.f32 %v212_v20, %v194_v7 }
 0x224   :  { %v217_v25 = vmul.f32 0.7978846, %v213_v21  ;;  %v214_v26 = vadd.f32 %v210_v22, %v186_v10 }
 0x225   :  { %315 = vtanh.f32 %v219_v23  ;;  %v220_v27 = vmul.f32 0.7978846, %v216_v24 }
 0x226   :  { %317 = vtanh.f32 %v217_v25  ;;  %v218_v28 = vmul.f32 0.7978846, %v214_v26 }
 0x227   :  { %319 = vtanh.f32 %v220_v27 }
 0x228   :  { %321 = vtanh.f32 %v218_v28 }
 0x22f   :  { %v316_v29 = vpop.eup %315 }
 0x230   :  { %v318_v30 = vpop.eup %317  ;;  %v227_v31 = vadd.f32 1.0, %v316_v29 }
 0x231   :  { %v320_v32 = vpop.eup %319  ;;  %v225_v33 = vadd.f32 1.0, %v318_v30 }
 0x232   :  { %v322_v34 = vpop.eup %321  ;;  %v228_v37 = vadd.f32 1.0, %v320_v32  ;;  %v231_v41 = vmul.f32 %v227_v31, %v199_v35 }
 0x233   :  { %v226_v40 = vadd.f32 1.0, %v322_v34  ;;  %v229_v43 = vmul.f32 %v225_v33, %v197_v38 }
 0x234   :  { %v232_v42 = vmul.f32 %v228_v37, %v200_v36 }
 0x235   :  { %v230_v44 = vmul.f32 %v226_v40, %v198_v39 }
 0x236   :  { %v282_v45 = vpack.c.bf16 %v232_v42, %v231_v41 }
 0x237   :  { %v277_v46 = vpack.c.bf16 %v230_v44, %v229_v43 }
 0x238   :  { %284 = vst [vmem:[%s407_s5 + $0x8] sm:$0xff] %v282_v45  }
 0x239   :  { %278 = vst [vmem:[%s407_s5] sm:$0xff] %v277_v46  }

// kernel: vit_enc_forward.17
= control target key start
LH: loop header
LB: loop body
LE: loop exit
PB: predicated region body
PF: predicated region fallthrough
CT: control target
= control target key end

     0   :  { %s303_s1 = inlined_call_operand.vmem [shape: bf16[128,128], index: 1, kind: input, shape index: {}]   ;;  %s304_s0 = inlined_call_operand.vmem [shape: bf16[32,128], index: 0, kind: input, shape index: {}]   ;;  %s305_s2 = inlined_call_operand.vmem [shape: f32[1,128], index: 2, kind: input, shape index: {}]   ;;  %s306_s3 = inlined_call_operand.vmem [shape: f32[32,128], index: 3, kind: input, shape index: {}]   ;;  %s307_s4 = inlined_call_operand.vmem [shape: f32[32,128], index: 4, kind: output, shape index: {}]  }
   0x1   :  { %v211_v0 = vld [vmem:[%s303_s1] sm:$0xff]   ;;  %v212_v1 = vld [vmem:[%s303_s1 + $0x8] sm:$0xff]   ;;  %v213_v2 = vld [vmem:[%s303_s1 + $0x10] sm:$0xff]  }
   0x2   :  { %191 = vmatprep.subr.bf16.mxu0 %v211_v0  ;;  %v214_v3 = vld [vmem:[%s303_s1 + $0x18] sm:$0xff]   ;;  %v219_v4 = vld [vmem:[%s304_s0] sm:$0xff]   ;;  %v216_v6 = vld [vmem:[%s303_s1 + $0x28] sm:$0xff]  }
   0x3   :  { %192 = vmatpush3.bf16.msra.mxu0 %v211_v0  ;;  %207 = vmatprep.mubr.bf16.mxu0 %v219_v4  ;;  %v215_v5 = vld [vmem:[%s303_s1 + $0x20] sm:$0xff]   ;;  %v217_v7 = vld [vmem:[%s303_s1 + $0x30] sm:$0xff]   ;;  %v218_v8 = vld [vmem:[%s303_s1 + $0x38] sm:$0xff]  }
   0x4   :  { %193 = vmatprep.subr.bf16.mxu0 %v212_v1  ;;  %v220_v9 = vld [vmem:[%s304_s0 + $0x8] sm:$0xff]   ;;  %v170_v10 = vld [vmem:[%s305_s2] ss:$0 sm:$0xff]  ;;  %v156_v12 = vld [vmem:[%s306_s3 + $0x10] sm:$0xff] }
   0x5   :  { %v154_v15 = vld [vmem:[%s306_s3] sm:$0xff]  ;;  %v157_v18 = vld [vmem:[%s306_s3 + $0x18] sm:$0xff]  ;;  %v155_v22 = vld [vmem:[%s306_s3 + $0x8] sm:$0xff] }
   0x7   :  { %194 = vmatpush3.bf16.msra.mxu0 %v212_v1 }
   0x8   :  { %195 = vmatprep.subr.bf16.mxu0 %v213_v2 }
   0xb   :  { %196 = vmatpush3.bf16.msra.mxu0 %v213_v2 }
   0xc   :  { %197 = vmatprep.subr.bf16.mxu0 %v214_v3 }
   0xf   :  { %198 = vmatpush3.bf16.msra.mxu0 %v214_v3 }
  0x10   :  { %199 = vmatprep.subr.bf16.mxu0 %v215_v5 }
  0x13   :  { %200 = vmatpush3.bf16.msra.mxu0 %v215_v5 }
  0x14   :  { %201 = vmatprep.subr.bf16.mxu0 %v216_v6 }
  0x17   :  { %202 = vmatpush3.bf16.msra.mxu0 %v216_v6 }
  0x18   :  { %203 = vmatprep.subr.bf16.mxu0 %v217_v7 }
  0x1b   :  { %204 = vmatpush3.bf16.msra.mxu0 %v217_v7 }
  0x1c   :  { %205 = vmatprep.subr.bf16.mxu0 %v218_v8 }
  0x1f   :  { %206 = vmatpush3.bf16.msra.mxu0 %v218_v8 }
  0x22   :  { %208 = vmatmul.mubr.bf16.vlgmr.msra.gmra.mrb[0].mxu0 %v220_v9 }
  0xf5   :  { %v209_v11 = vpop.f32.mrb[0].mxu0 }
  0xf6   :  { %v148_v13 = vadd.f32 %v209_v11, %v170_v10  ;;  %v139_v14 = vpop.f32.mrb[1].mxu0 }
  0xf7   :  { %v140_v16 = vadd.f32 %v170_v10, %v139_v14  ;;  %v210_v17 = vpop.f32.mrb[2].mxu0 }
  0xf8   :  { %v160_v19 = vadd.f32 %v156_v12, %v148_v13  ;;  %v151_v20 = vadd.f32 %v210_v17, %v170_v10  ;;  %v142_v21 = vpop.f32.mrb[3].mxu0 }
  0xf9   :  { %v158_v23 = vadd.f32 %v154_v15, %v140_v16  ;;  %v143_v24 = vadd.f32 %v170_v10, %v142_v21 }
  0xfa   :  { %164 = vst [vmem:[%s307_s4 + $0x10] sm:$0xff] %v160_v19  ;;  %v161_v25 = vadd.f32 %v157_v18, %v151_v20 }
  0xfb   :  { %162 = vst [vmem:[%s307_s4] sm:$0xff] %v158_v23  ;;  %v159_v26 = vadd.f32 %v155_v22, %v143_v24 }
  0xfc   :  { %165 = vst [vmem:[%s307_s4 + $0x18] sm:$0xff] %v161_v25 }
  0xfd   :  { %163 = vst [vmem:[%s307_s4 + $0x8] sm:$0xff] %v159_v26 }

// kernel: vit_enc_forward.23
= control target key start
LH: loop header
LB: loop body
LE: loop exit
PB: predicated region body
PF: predicated region fallthrough
CT: control target
= control target key end

     0   :  { %vm23_vm0 = vcmask 523264   ;;  %v194_v15 = vmov 0.0   ;;  %vm195_vm1 = vmmov 0   ;;  %s264_s0 = inlined_call_operand.vmem [shape: f32[16,64], index: 0, kind: input, shape index: {}]   ;;  %s265_s3 = inlined_call_operand.vmem [shape: bf16[64,128], index: 3, kind: input, shape index: {}]   ;;  %s266_s1 = inlined_call_operand.vmem [shape: f32[1,64], index: 1, kind: input, shape index: {}]   ;;  %s267_s2 = inlined_call_operand.vmem [shape: f32[1,64], index: 2, kind: input, shape index: {}]   ;;  %s268_s4 = inlined_call_operand.vmem [shape: f32[1,128], index: 4, kind: input, shape index: {}]   ;;  %s269_s5 = inlined_call_operand.vmem [shape: f32[16,128], index: 5, kind: output, shape index: {}]  }
   0x1   :  { %v21_v0 = vld [vmem:[%s264_s0] sm:$0xff]  ;;  %v22_v1 = vld [vmem:[%s264_s0 + $0x8] sm:$0xff]  ;;  %172 = vmatprep.subr.bf16.mxu0 %v194_v15  ;;  %v188_v17 = vld [vmem:[%s265_s3 + $0x10] sm:$0xff]   ;;  %180 = vmatprep.mubr.msk.bf16.mxu0 %vm195_vm1, %v194_v15 }
   0x2   :  { %v24_v2 = vsel %vm23_vm0, %v21_v0, 0.0  ;;  %v27_v3 = vsel %vm23_vm0, %v22_v1, 0.0  ;;  %v186_v14 = vld [vmem:[%s265_s3] sm:$0xff]   ;;  %v187_v16 = vld [vmem:[%s265_s3 + $0x8] sm:$0xff]   ;;  %v189_v18 = vld [vmem:[%s265_s3 + $0x18] sm:$0xff]  }
   0x3   :  { %25 = vadd.xlane.f32.xlu0 %v24_v2  ;;  %173 = vmatpush3.bf16.msra.mxu0 %v186_v14  ;;  %v159_v27 = vld [vmem:[%s266_s1] ss:$0 sm:$0xff] }
   0x4   :  { %174 = vmatprep.subr.bf16.mxu0 %v194_v15  ;;  %v160_v31 = vld [vmem:[%s267_s2] ss:$0 sm:$0xff] }
   0x5   :  { %v161_v36 = vld [vmem:[%s268_s4] ss:$0 sm:$0xff] }
   0x7   :  { %28 = vadd.xlane.f32.xlu0 %v27_v3  ;;  %175 = vmatpush3.bf16.msra.mxu0 %v187_v16 }
   0x8   :  { %176 = vmatprep.subr.bf16.mxu0 %v194_v15 }
   0xb   :  { %177 = vmatpush3.bf16.msra.mxu0 %v188_v17 }
   0xc   :  { %178 = vmatprep.subr.bf16.mxu0 %v194_v15 }
   0xf   :  { %179 = vmatpush3.bf16.msra.mxu0 %v189_v18 }
  0x90   :  { %v26_v4 = vpop.xlane.xlu0 %25 }
  0x91   :  { %v31_v5 = vmul.f32 0.015625, %v26_v4 }
  0x93   :  { %v33_v6 = vsub.f32 %v21_v0, %v31_v5 }
  0x94   :  { %v29_v7 = vpop.xlane.xlu0 %28 }
  0x95   :  { %v32_v8 = vmul.f32 0.015625, %v29_v7  ;;  %v35_v9 = vmul.f32 %v33_v6, %v33_v6 }
  0x97   :  { %v34_v10 = vsub.f32 %v22_v1, %v32_v8  ;;  %v37_v11 = vsel %vm23_vm0, %v35_v9, 0.0 }
  0x98   :  { %38 = vadd.xlane.f32.xlu1 %v37_v11 }
  0x99   :  { %v36_v12 = vmul.f32 %v34_v10, %v34_v10 }
  0x9b   :  { %v40_v13 = vsel %vm23_vm0, %v36_v12, 0.0 }
  0x9c   :  { %41 = vadd.xlane.f32.xlu1 %v40_v13 }
 0x125   :  { %v39_v19 = vpop.xlane.xlu1 %38 }
 0x126   :  { %v43_v20 = vmul.f32 0.015625, %v39_v19 }
 0x128   :  { %v45_v21 = vadd.f32 1e-05, %v43_v20 }
 0x129   :  { %v42_v22 = vpop.xlane.xlu1 %41 }
 0x12a   :  { %190 = vrsqrt.f32 %v45_v21  ;;  %v44_v23 = vmul.f32 0.015625, %v42_v22 }
 0x12c   :  { %v46_v24 = vadd.f32 1e-05, %v44_v23 }
 0x12e   :  { %192 = vrsqrt.f32 %v46_v24 }
 0x134   :  { %v191_v25 = vpop.eup %190 }
 0x135   :  { %v49_v26 = vmul.f32 %v191_v25, %v33_v6 }
 0x137   :  { %v58_v30 = vmul.f32 %v159_v27, %v49_v26 }
 0x138   :  { %v193_v28 = vpop.eup %192 }
 0x139   :  { %v50_v29 = vmul.f32 %v193_v28, %v34_v10  ;;  %v67_v33 = vadd.f32 %v160_v31, %v58_v30 }
 0x13b   :  { %v59_v32 = vmul.f32 %v159_v27, %v50_v29 }
 0x13d   :  { %v68_v34 = vadd.f32 %v160_v31, %v59_v32 }
 0x13f   :  { %v69_v35 = vpack.c.bf16 %v68_v34, %v67_v33 }
 0x141   :  { %181 = vmatmul.mubr.msk.bf16.vlgmr.msra.gmra.mrb[0].mxu0 %vm23_vm0, %v69_v35 }
 0x214   :  { %v146_v37 = vpop.f32.mrb[0].mxu0 }
 0x215   :  { %v147_v38 = vadd.f32 %v161_v36, %v146_v37  ;;  %v182_v39 = vpop.f32.mrb[1].mxu0 }
 0x216   :  { %v149_v40 = vpop.f32.mrb[2].mxu0 }
 0x217   :  { %153 = vst [vmem:[%s269_s5] sm:$0xff] %v147_v38  ;;  %v150_v41 = vadd.f32 %v161_v36, %v149_v40  ;;  %v183_v42 = vpop.f32.mrb[3].mxu0 }
 0x219   :  { %154 = vst [vmem:[%s269_s5 + $0x8] sm:$0xff] %v150_v41 }

</bundles_post_ra>
